<compile_context>
chip_gen: v7x
topology: tpu7x:2x2x1
jax: 0.10.0
libtpu: 0.0.40
codegen_flags: <defaults>
</compile_context>

<pallas_src>
import functools

import numpy as np
import jax
import jax.numpy as jnp
from jax.experimental import pallas as pl
from jax.experimental.pallas import tpu as pltpu


_KRON_MAX_HW = 512      # fused 2-D DFT matrix path when H*W <= this


# -----------------------------------------------------------------------------
# Host-side DFT constants
# -----------------------------------------------------------------------------
def _dft_matrix(n):
    """Ortho-normalized n-point DFT matrix (complex, symmetric)."""
    idx = np.arange(n)
    ang = -2.0 * np.pi * np.outer(idx, idx) / n
    return (np.cos(ang) + 1j * np.sin(ang)) / np.sqrt(n)


def _right_mult_blocks(g):
    """Real block matrices right-multiplying a lane-packed [Re | Im] slab by the
    complex matrix g (fwd) and conj(g) (inv), each as ONE real matmul:
        [Ur | Ui] @ [[Gr,  Gi], [-Gi, Gr]] = [Re(U G)       | Im(U G)]
        [Ur | Ui] @ [[Gr, -Gi], [ Gi, Gr]] = [Re(U conj(G)) | Im(U conj(G))]
    """
    gr = np.real(g).astype(np.float32)
    gi = np.imag(g).astype(np.float32)
    fwd = np.block([[gr, gi], [-gi, gr]]).astype(np.float32)
    inv = np.block([[gr, -gi], [gi, gr]]).astype(np.float32)
    return fwd, inv


def _kron_block_matrices(h, w):
    """Fused 2-D ortho DFT on a row-major-flattened (H, W) plane:
    vec_row(F_H @ X @ F_W) = (F_H kron F_W) @ vec_row(X)."""
    return _right_mult_blocks(np.kron(_dft_matrix(h), _dft_matrix(w)))


def _sep_block_matrices(n):
    """Per-axis block matrices for the separable (large H*W) fallback."""
    return _right_mult_blocks(_dft_matrix(n))


# -----------------------------------------------------------------------------
# Tiling / VMEM helpers
# -----------------------------------------------------------------------------
def _kron_batch_tile(n, target=256):
    """Batch tile = matmul M dim = block sublane dim: a multiple of 8 dividing N
    (or N itself), sized toward `target` rows, keeping >= 2 grid steps whenever
    N allows so v7x's two TensorCores both get work."""
    if n <= 8 or n % 8 != 0:
        return n
    divs = [d for d in range(8, n, 8) if n % d == 0]      # proper divisors
    good = [d for d in divs if d <= target]
    if good:
        return max(good)
    return min(divs) if divs else n


def _sep_batch_tile(n, h, target_rows=256):
    """Batch tile for the separable path (M dim = bt*h); bt is a leading block
    dim so only divisibility of N matters."""
    per = max(1, target_rows // max(h, 1))
    divs = [d for d in range(1, n + 1) if n % d == 0 and d <= per]
    multi = [d for d in divs if n // d >= 2]
    if multi:
        return max(multi)
    return max(divs) if divs else 1


def _vmem_limit_bytes(est_bytes):
    """Raise v5e's 16 MiB scoped default; stay under v7x's 64 MiB physical."""
    return int(min(max(3 * est_bytes // 2, 32 << 20), 56 << 20))


def _const_matrix_spec(shape, single_buffer):
    """Grid-invariant operand: single-buffer it when the grid has >1 step so
    only one VMEM copy of each (possibly multi-MiB) DFT matrix is resident."""
    if single_buffer:
        try:
            return pl.BlockSpec(shape, lambda i: (0, 0),
                                pipeline_mode=pl.Buffered(1))
        except (TypeError, ValueError, AttributeError):
            pass                      # API without pipeline_mode: default buffering
    return pl.BlockSpec(shape, lambda i: (0, 0))


# -----------------------------------------------------------------------------
# Kernels
# -----------------------------------------------------------------------------
def _dc_kron_kernel(x_ref, k0_ref, m_ref, gf_ref, gi_ref, o_ref, *, c):
    """Fused path: x/k0/mask/out are (bt, 2*H*W) lane-packed [Re | Im] slabs."""
    dot = lambda a, b: jnp.dot(a.astype(b.dtype), b,
                               preferred_element_type=jnp.float32)
    k = dot(x_ref[...], gf_ref[...])                        # fft2 -> [Kr | Ki]
    blend = m_ref[...] * (k0_ref[...].astype(jnp.float32) - k)
    d = k + (blend if c == 1.0 else c * blend)              # data consistency
    o_ref[...] = dot(d, gi_ref[...]).astype(o_ref.dtype)    # ifft2 -> [Or | Oi]


def _dc_sep_kernel(x_ref, k0_ref, m_ref, rwf_ref, rhf_ref, rhi_ref, rwi_ref,
                   o_ref, *, bt, h, w, c):
    """Separable fallback for large H*W: W-pass is a fused right-multiply on the
    lane-packed [Re | Im] slab; H-pass is a fused right-multiply on its batched
    transpose.  Transposes are single batched swapaxes ops (no per-plane Python
    loop) and all I/O stays in the natural (N, 2, H, W) layout."""
    dot2 = lambda a, b: jnp.dot(a.astype(b.dtype), b,
                                preferred_element_type=jnp.float32)

    def lane_pack(ref):                  # (bt, 2, h, w) -> (bt*h, 2w)  [Re | Im]
        return jnp.concatenate([ref[:, 0], ref[:, 1]],
                               axis=-1).reshape(bt * h, 2 * w)

    def t_phase(slab, rows, cols):       # (bt*rows, 2c) -> (bt*cols, 2r), batched
        s3 = slab.reshape(bt, rows, 2 * cols)
        re = jnp.swapaxes(s3[..., :cols], -1, -2)
        im = jnp.swapaxes(s3[..., cols:], -1, -2)
        return jnp.concatenate([re, im], axis=-1).reshape(bt * cols, 2 * rows)

    xl = lane_pack(x_ref)
    t = dot2(xl, rwf_ref[...])                        # X @ F_W
    kt = dot2(t_phase(t, h, w), rhf_ref[...])         # (F_H @ T)^T, lane-packed
    kl = t_phase(kt, w, h)                            # K, natural orientation

    blend = lane_pack(m_ref) * (lane_pack(k0_ref).astype(jnp.float32) - kl)
    dl = kl + (blend if c == 1.0 else c * blend)      # data consistency

    vt = dot2(t_phase(dl, h, w), rhi_ref[...])        # (conj(F_H) @ D)^T
    ol = dot2(t_phase(vt, w, h), rwi_ref[...])        # V @ conj(F_W)
    ol = ol.reshape(bt, h, 2 * w)
    o_ref[:, 0] = ol[..., :w].astype(o_ref.dtype)
    o_ref[:, 1] = ol[..., w:].astype(o_ref.dtype)


# -----------------------------------------------------------------------------
# Wrappers
# -----------------------------------------------------------------------------
def _dc_kron(x, k0, mask, c, use_bf16):
    n, _, h, w = x.shape
    hw = h * w
    cdt = jnp.bfloat16 if use_bf16 else jnp.float32
    gf_np, gi_np = _kron_block_matrices(h, w)
    gf = jnp.asarray(gf_np, dtype=cdt)
    gi = jnp.asarray(gi_np, dtype=cdt)

    # (N,2,H,W) -> (N, 2*H*W) is a pure bitcast reshape: each row is already the
    # lane-packed [vec(Re) | vec(Im)] slab, and the mask's identical channels
    # are exactly its lane-duplicated form.  No HBM re-layout pass.
    x2 = x.reshape(n, 2 * hw).astype(cdt)
    k02 = k0.reshape(n, 2 * hw).astype(cdt)
    m2 = mask.reshape(n, 2 * hw)

    bt = _kron_batch_tile(n)
    steps = n // bt
    row_spec = pl.BlockSpec((bt, 2 * hw), lambda i: (i, 0))
    mat_spec = _const_matrix_spec((2 * hw, 2 * hw), steps > 1)

    est = 4 * (2 * 2 * (2 * hw) * (2 * hw)     # fwd+inv matrices (worst case 2 bufs)
               + 2 * 4 * bt * 2 * hw           # x/k0/mask/out tiles, double-buffered
               + 4 * bt * 2 * hw)              # in-kernel temporaries
    out2 = pl.pallas_call(
        functools.partial(_dc_kron_kernel, c=c),
        out_shape=jax.ShapeDtypeStruct((n, 2 * hw), jnp.float32),
        grid_spec=pltpu.PrefetchScalarGridSpec(
            num_scalar_prefetch=0,
            grid=(steps,),
            in_specs=[row_spec, row_spec, row_spec, mat_spec, mat_spec],
            out_specs=row_spec),
        compiler_params=pltpu.CompilerParams(
            dimension_semantics=("parallel",),
            vmem_limit_bytes=_vmem_limit_bytes(est)),
    )(x2, k02, m2, gf, gi)
    return out2.reshape(n, 2, h, w)


def _dc_separable(x, k0, mask, c, use_bf16):
    n, _, h, w = x.shape
    cdt = jnp.bfloat16 if use_bf16 else jnp.float32
    rwf_np, rwi_np = _sep_block_matrices(w)
    rhf_np, rhi_np = _sep_block_matrices(h)
    rwf, rwi = jnp.asarray(rwf_np, dtype=cdt), jnp.asarray(rwi_np, dtype=cdt)
    rhf, rhi = jnp.asarray(rhf_np, dtype=cdt), jnp.asarray(rhi_np, dtype=cdt)
    xc, k0c = x.astype(cdt), k0.astype(cdt)

    bt = _sep_batch_tile(n, h)
    steps = n // bt
    img_spec = pl.BlockSpec((bt, 2, h, w), lambda i: (i, 0, 0, 0))
    mat_w = _const_matrix_spec((2 * w, 2 * w), steps > 1)
    mat_h = _const_matrix_spec((2 * h, 2 * h), steps > 1)

    est = 4 * (2 * 2 * ((2 * w) ** 2 + (2 * h) ** 2)   # 4 DFT matrices, 2 bufs worst
               + 2 * 4 * bt * 2 * h * w                # x/k0/mask/out tiles, 2 bufs
               + 8 * bt * 2 * h * w)                   # in-kernel slabs / transposes
    return pl.pallas_call(
        functools.partial(_dc_sep_kernel, bt=bt, h=h, w=w, c=c),
        out_shape=jax.ShapeDtypeStruct((n, 2, h, w), jnp.float32),
        grid_spec=pltpu.PrefetchScalarGridSpec(
            num_scalar_prefetch=0,
            grid=(steps,),
            in_specs=[img_spec, img_spec, img_spec, mat_w, mat_h, mat_h, mat_w],
            out_specs=img_spec),
        compiler_params=pltpu.CompilerParams(
            dimension_semantics=("parallel",),
            vmem_limit_bytes=_vmem_limit_bytes(est)),
    )(xc, k0c, mask, rwf, rhf, rhi, rwi)


def _dc_4d(x, k0, mask, c, use_bf16):
    n, ch, h, w = x.shape
    assert ch == 2, "channel dim must hold (real, imag)"
    if h * w <= _KRON_MAX_HW:
        return _dc_kron(x, k0, mask, c, use_bf16)
    return _dc_separable(x, k0, mask, c, use_bf16)


@functools.partial(jax.jit, static_argnames=("tau", "use_bf16"))
def data_consistency_pallas(x, k0, mask, tau=None, *, use_bf16=False):
    """Data-consistency layer.  x/k0/mask: (N,2,H,W) or (N,2,H,W,T) float32."""
    # Mirrors torch `if tau:` (None or 0 -> hard replacement of sampled points).
    c = float(tau) / (1.0 + float(tau)) if tau else 1.0
    if x.ndim == 5:
        # Fold the temporal axis into the batch (FFT is over H, W only).
        n, ch, h, w, t = x.shape
        fold = lambda a: jnp.moveaxis(a, -1, 1).reshape(n * t, ch, h, w)
        out4 = _dc_4d(fold(x), fold(k0), fold(mask), c, use_bf16)
        return jnp.moveaxis(out4.reshape(n, t, ch, h, w), 1, -1)
    return _dc_4d(x, k0, mask, c, use_bf16)


# -----------------------------------------------------------------------------
# Pure-JAX reference (mirrors the PyTorch module, 4-D case)
# -----------------------------------------------------------------------------
def _reference(x, k0, mask, tau=None):
    xc = x[:, 0] + 1j * x[:, 1]
    k = jnp.fft.fft2(xc, norm="ortho")
    kr, ki = jnp.real(k), jnp.imag(k)
    if tau:
        dr = (1 - mask[:, 0]) * kr + mask[:, 0] * (kr + tau * k0[:, 0]) / (1 + tau)
        di = (1 - mask[:, 1]) * ki + mask[:, 1] * (ki + tau * k0[:, 1]) / (1 + tau)
    else:
        dr = (1 - mask[:, 0]) * kr + mask[:, 0] * k0[:, 0]
        di = (1 - mask[:, 1]) * ki + mask[:, 1] * k0[:, 1]
    out = jnp.fft.ifft2(dr + 1j * di, norm="ortho")
    return jnp.stack([jnp.real(out), jnp.imag(out)], axis=1)


if __name__ == "__main__":
    N, C, H, W = 2, 2, 16, 16   # channel dim = 2 (real, imag)
    key = jax.random.PRNGKey(0)
    kx, kk, km = jax.random.split(key, 3)

    x = jax.random.normal(kx, (N, C, H, W), dtype=jnp.float32)
    k0 = jax.random.normal(kk, (N, C, H, W), dtype=jnp.float32)
    m2d = (jax.random.uniform(km, (N, 1, H, W)) > 0.5).astype(jnp.float32)
    mask = jnp.concatenate([m2d, m2d], axis=1)

    # tau = None path (hard replacement of sampled k-space points)
    out = jax.block_until_ready(data_consistency_pallas(x, k0, mask, tau=None))
    ref = _reference(x, k0, mask, tau=None)
    np.testing.assert_allclose(np.asarray(out), np.asarray(ref), atol=2e-4, rtol=2e-4)

    # tau path (validates the folded  K + c*M*(K0-K)  blend)
    out_t = jax.block_until_ready(data_consistency_pallas(x, k0, mask, tau=0.5))
    ref_t = _reference(x, k0, mask, tau=0.5)
    np.testing.assert_allclose(np.asarray(out_t), np.asarray(ref_t), atol=2e-4, rtol=2e-4)

    print("KERNEL_OK")
</pallas_src>

<mosaic_0001>
module attributes {stable_mosaic.version = 11 : i64} {
  func.func @_dc_kron_kernel(%arg0: i32, %arg1: memref<2x512xf32, #tpu.memory_space<vmem>>, %arg2: memref<2x512xf32, #tpu.memory_space<vmem>>, %arg3: memref<2x512xf32, #tpu.memory_space<vmem>>, %arg4: memref<512x512xf32, #tpu.memory_space<vmem>>, %arg5: memref<512x512xf32, #tpu.memory_space<vmem>>, %arg6: memref<2x512xf32, #tpu.memory_space<vmem>>) attributes {dimension_semantics = [#tpu.dimension_semantics<parallel>], iteration_bounds = array<i64: 1>, scalar_prefetch = 0 : i64, scratch_operands = 0 : i64, tpu.core_type = #tpu.core_type<tc>, window_params = [{transform_indices = @transform_0, window_bounds = array<i64: 2, 512>}, {transform_indices = @transform_1, window_bounds = array<i64: 2, 512>}, {transform_indices = @transform_2, window_bounds = array<i64: 2, 512>}, {pipeline_mode = #tpu.pipeline_mode<synchronous>, transform_indices = @transform_3, window_bounds = array<i64: 512, 512>}, {pipeline_mode = #tpu.pipeline_mode<synchronous>, transform_indices = @transform_4, window_bounds = array<i64: 512, 512>}, {transform_indices = @transform_5, window_bounds = array<i64: 2, 512>}]} {
    %c0 = arith.constant 0 : index
    %c0_0 = arith.constant 0 : index
    %0 = vector.load %arg1[%c0, %c0_0] : memref<2x512xf32, #tpu.memory_space<vmem>>, vector<2x512xf32>
    %c0_1 = arith.constant 0 : index
    %c0_2 = arith.constant 0 : index
    %1 = vector.load %arg4[%c0_1, %c0_2] : memref<512x512xf32, #tpu.memory_space<vmem>>, vector<512x512xf32>
    %cst = arith.constant dense<0.000000e+00> : vector<2x512xf32>
    %2 = tpu.matmul %0, %1, %cst {dimension_numbers = #tpu.dot_dimension_numbers<[1], [0], [0], [1], [0, 0, 1, 1], [], []>} : vector<2x512xf32>, vector<512x512xf32>, vector<2x512xf32> -> vector<2x512xf32>
    %c0_3 = arith.constant 0 : index
    %c0_4 = arith.constant 0 : index
    %3 = vector.load %arg3[%c0_3, %c0_4] : memref<2x512xf32, #tpu.memory_space<vmem>>, vector<2x512xf32>
    %c0_5 = arith.constant 0 : index
    %c0_6 = arith.constant 0 : index
    %4 = vector.load %arg2[%c0_5, %c0_6] : memref<2x512xf32, #tpu.memory_space<vmem>>, vector<2x512xf32>
    %5 = arith.subf %4, %2 : vector<2x512xf32>
    %6 = arith.mulf %3, %5 : vector<2x512xf32>
    %7 = arith.addf %2, %6 : vector<2x512xf32>
    %c0_7 = arith.constant 0 : index
    %c0_8 = arith.constant 0 : index
    %8 = vector.load %arg5[%c0_7, %c0_8] : memref<512x512xf32, #tpu.memory_space<vmem>>, vector<512x512xf32>
    %cst_9 = arith.constant dense<0.000000e+00> : vector<2x512xf32>
    %9 = tpu.matmul %7, %8, %cst_9 {dimension_numbers = #tpu.dot_dimension_numbers<[1], [0], [0], [1], [0, 0, 1, 1], [], []>} : vector<2x512xf32>, vector<512x512xf32>, vector<2x512xf32> -> vector<2x512xf32>
    %c0_10 = arith.constant 0 : index
    %c0_11 = arith.constant 0 : index
    %10 = vector.load %arg6[%c0_10, %c0_11] : memref<2x512xf32, #tpu.memory_space<vmem>>, vector<2x512xf32>
    tpu.vector_store %arg6[%c0_10, %c0_11], %9 {strides = array<i32>} : memref<2x512xf32, #tpu.memory_space<vmem>>, vector<2x512xf32>,
    return
  }
  func.func @transform_0(%arg0: i32) -> (i32, i32) {
    %c0_i32 = arith.constant 0 : i32
    %c0_i32_0 = arith.constant 0 : i32
    return %arg0, %c0_i32 : i32, i32
  }
  func.func @transform_1(%arg0: i32) -> (i32, i32) {
    %c0_i32 = arith.constant 0 : i32
    %c0_i32_0 = arith.constant 0 : i32
    return %arg0, %c0_i32 : i32, i32
  }
  func.func @transform_2(%arg0: i32) -> (i32, i32) {
    %c0_i32 = arith.constant 0 : i32
    %c0_i32_0 = arith.constant 0 : i32
    return %arg0, %c0_i32 : i32, i32
  }
  func.func @transform_3(%arg0: i32) -> (i32, i32) {
    %c0_i32 = arith.constant 0 : i32
    %c0_i32_0 = arith.constant 0 : i32
    %c0_i32_1 = arith.constant 0 : i32
    return %c0_i32, %c0_i32_0 : i32, i32
  }
  func.func @transform_4(%arg0: i32) -> (i32, i32) {
    %c0_i32 = arith.constant 0 : i32
    %c0_i32_0 = arith.constant 0 : i32
    %c0_i32_1 = arith.constant 0 : i32
    return %c0_i32, %c0_i32_0 : i32, i32
  }
  func.func @transform_5(%arg0: i32) -> (i32, i32) {
    %c0_i32 = arith.constant 0 : i32
    %c0_i32_0 = arith.constant 0 : i32
    return %arg0, %c0_i32 : i32, i32
  }
}

</mosaic_0001>

<bundles_post_ra>
// kernel: data_consistency_pallas.1
= control target key start
LH: loop header
LB: loop body
LE: loop exit
PB: predicated region body
PF: predicated region fallthrough
CT: control target
= control target key end

     0   :  { %10 = vsyncpa [#allocation3], 0  ;;  %s1908_s0 = inlined_call_operand.vmem [shape: f32[2,512], index: 0, kind: input, shape index: {}]   ;;  %s1909_s1 = inlined_call_operand.vmem [shape: f32[2,512], index: 1, kind: input, shape index: {}]   ;;  %s1910_s2 = inlined_call_operand.vmem [shape: f32[2,512], index: 2, kind: input, shape index: {}]   ;;  %s1911_s3 = inlined_call_operand.hbm [shape: f32[512,512], index: 3, kind: input, shape index: {}]   ;;  %s1912_s4 = inlined_call_operand.hbm [shape: f32[512,512], index: 4, kind: input, shape index: {}]   ;;  %s1913_s5 = inlined_call_operand.vmem [shape: f32[2,512], index: 5, kind: output, shape index: {}]  }
   0x1   :  { %11 = vsyncpa [#allocation5], 0  ;;  %s1806_s18 = smov [#allocation2]   ;;  %s1758_s22 = scalar_lea.hbm %s1911_s3, 32768 }
   0x2   :  { %s23_s19 = sshll.u32 %s1806_s18, 4  ;;  %p1759_p0 = scmp.ne.s32.totalorder %s1911_s3, %s1758_s22  ;;  %s24_s19 = int_to_ptr.vmem [resolvable:$true] %s23_s19 }
   0x3   :  { %p1762_p1 = scmp.lt.u32.totalorder %s1758_s22, %s1911_s3 }
   0x5   :  { %p1764_p2 = pnand %p1762_p1, %p1759_p0 }
   0x7   :  { %1767 = shalt.err (!%p1764_p2)
}
   0x8   :  { %s1768_s27 = scalar_lea.vmem %s24_s19, 32768  ;;  %p1773_p4 = scmp.lt.s32.totalorder %s24_s19, %s24_s19 }
   0x9   :  { %p1769_p3 = scmp.ne.s32.totalorder %s24_s19, %s1768_s27  ;;  %p1774_p5 = scmp.lt.s32.totalorder %s1768_s27, %s1768_s27 }
   0xb   :  { %p1775_p6 = por %p1774_p5, %p1773_p4 }
   0xd   :  { %p1776_p7 = pnand %p1775_p6, %p1769_p3 }
   0xf   :  { %1779 = shalt.err (!%p1776_p7)
}
  0x10   :  { %s1807_s28 = smov 512   ;;  %s1808_s29 = smov 32  }
  0x11   :  { %29 = dma.hbm_to_vmem [thread:$0]  %s1911_s3, 32768, %s24_s19, [#allocation3], %s1807_s28, %s1807_s28, %s1808_s29  }
  0x12   :  { %s1809_s7 = smov [#allocation4]   ;;  %s1780_s11 = scalar_lea.hbm %s1912_s4, 32768 }
  0x13   :  { %s35_s8 = sshll.u32 %s1809_s7, 4  ;;  %p1781_p8 = scmp.ne.s32.totalorder %s1912_s4, %s1780_s11  ;;  %s36_s8 = int_to_ptr.vmem [resolvable:$true] %s35_s8 }
  0x14   :  { %p1784_p9 = scmp.lt.u32.totalorder %s1780_s11, %s1912_s4 }
  0x16   :  { %p1786_p10 = pnand %p1784_p9, %p1781_p8 }
  0x18   :  { %1789 = shalt.err (!%p1786_p10)
}
  0x19   :  { %s1790_s16 = scalar_lea.vmem %s36_s8, 32768  ;;  %p1795_p12 = scmp.lt.s32.totalorder %s36_s8, %s36_s8 }
  0x1a   :  { %p1791_p11 = scmp.ne.s32.totalorder %s36_s8, %s1790_s16  ;;  %p1796_p13 = scmp.lt.s32.totalorder %s1790_s16, %s1790_s16 }
  0x1c   :  { %p1797_p0 = por %p1796_p13, %p1795_p12 }
  0x1e   :  { %p1798_p1 = pnand %p1797_p0, %p1791_p11 }
  0x20   :  { %1801 = shalt.err (!%p1798_p1)
}
  0x21   :  { %41 = dma.hbm_to_vmem [thread:$0]  %s1912_s4, 32768, %s36_s8, [#allocation5], %s1807_s28, %s1807_s28, %s1808_s29  }
  0x22   :  { %1802 = dma.done.wait [#allocation3], 32768  }
  0x23   :  { %1803 = vsyncadd [#allocation3], 4294934528 }
  0x24   :  { %1804 = dma.done.wait [#allocation5], 32768  }
  0x25   :  { %1805 = vsyncadd [#allocation5], 4294934528  ;;  %v50_v0 = vld [vmem:[#allocation2 + $0x8] sm:$0xff]  ;;  %v52_v2 = vld [vmem:[#allocation2 + $0x18] sm:$0xff] }
  0x26   :  { %v54_v1 = vld [vmem:[#allocation2 + $0x28] sm:$0xff]  ;;  %v56_v4 = vld [vmem:[#allocation2 + $0x38] sm:$0xff]  ;;  %v49_v5 = vld [vmem:[#allocation2] sm:$0xff] }
  0x27   :  { %v1232_v3 = vpack.c.bf16 %v54_v1, %v50_v0  ;;  %v53_v6 = vld [vmem:[#allocation2 + $0x20] sm:$0xff]  ;;  %v1360_v7 = vpack.c.bf16 %v56_v4, %v52_v2  ;;  %v51_v9 = vld [vmem:[#allocation2 + $0x10] sm:$0xff]  ;;  %v58_v11 = vld [vmem:[#allocation2 + $0x48] sm:$0xff] }
  0x28   :  { %v1234_v8 = vpack.c.bf16 %v53_v6, %v49_v5  ;;  %v55_v10 = vld [vmem:[#allocation2 + $0x30] sm:$0xff]  ;;  %v62_v13 = vld [vmem:[#allocation2 + $0x68] sm:$0xff]  ;;  %v60_v14 = vld [vmem:[#allocation2 + $0x58] sm:$0xff] }
  0x29   :  { %1233 = vmatprep.subr.bf16.mxu0 %v1232_v3  ;;  %v1362_v12 = vpack.c.bf16 %v55_v10, %v51_v9  ;;  %v64_v15 = vld [vmem:[#allocation2 + $0x78] sm:$0xff]  ;;  %1361 = vmatprep.subr.bf16.mxu1 %v1360_v7  ;;  %v1236_v16 = vpack.c.bf16 %v62_v13, %v58_v11  ;;  %v57_v18 = vld [vmem:[#allocation2 + $0x40] sm:$0xff]  ;;  %v59_v20 = vld [vmem:[#allocation2 + $0x50] sm:$0xff] }
  0x2a   :  { %1235 = vmatpush1.bf16.msra.mxu0 %v1234_v8  ;;  %v1364_v17 = vpack.c.bf16 %v64_v15, %v60_v14  ;;  %v61_v19 = vld [vmem:[#allocation2 + $0x60] sm:$0xff]  ;;  %v63_v22 = vld [vmem:[#allocation2 + $0x70] sm:$0xff]  ;;  %v66_v23 = vld [vmem:[#allocation2 + $0x88] sm:$0xff] }
  0x2b   :  { %1363 = vmatpush1.bf16.msra.mxu1 %v1362_v12  ;;  %v1238_v21 = vpack.c.bf16 %v61_v19, %v57_v18  ;;  %v70_v24 = vld [vmem:[#allocation2 + $0xa8] sm:$0xff]  ;;  %1237 = vmatprep.subr.bf16.mxu0 %v1236_v16  ;;  %v1366_v25 = vpack.c.bf16 %v63_v22, %v59_v20  ;;  %v68_v27 = vld [vmem:[#allocation2 + $0x98] sm:$0xff]  ;;  %v65_v29 = vld [vmem:[#allocation2 + $0x80] sm:$0xff] }
  0x2c   :  { %1365 = vmatprep.subr.bf16.mxu1 %v1364_v17  ;;  %v1240_v26 = vpack.c.bf16 %v70_v24, %v66_v23  ;;  %v72_v28 = vld [vmem:[#allocation2 + $0xb8] sm:$0xff]  ;;  %v69_v31 = vld [vmem:[#allocation2 + $0xa0] sm:$0xff]  ;;  %v67_v32 = vld [vmem:[#allocation2 + $0x90] sm:$0xff] }
  0x2d   :  { %v1368_v30 = vpack.c.bf16 %v72_v28, %v68_v27  ;;  %v71_v33 = vld [vmem:[#allocation2 + $0xb0] sm:$0xff]  ;;  %v1242_v34 = vpack.c.bf16 %v69_v31, %v65_v29  ;;  %v74_v35 = vld [vmem:[#allocation2 + $0xc8] sm:$0xff]  ;;  %v76_v37 = vld [vmem:[#allocation2 + $0xd8] sm:$0xff] }
  0x2e   :  { %1239 = vmatpush1.bf16.msra.mxu0 %v1238_v21  ;;  %v78_v36 = vld [vmem:[#allocation2 + $0xe8] sm:$0xff]  ;;  %v1370_v38 = vpack.c.bf16 %v71_v33, %v67_v32  ;;  %v80_v40 = vld [vmem:[#allocation2 + $0xf8] sm:$0xff]  ;;  %v73_v41 = vld [vmem:[#allocation2 + $0xc0] sm:$0xff] }
  0x2f   :  { %1367 = vmatpush1.bf16.msra.mxu1 %v1366_v25  ;;  %1241 = vmatprep.subr.bf16.mxu0 %v1240_v26  ;;  %v1244_v39 = vpack.c.bf16 %v78_v36, %v74_v35  ;;  %v77_v42 = vld [vmem:[#allocation2 + $0xe0] sm:$0xff]  ;;  %v1372_v43 = vpack.c.bf16 %v80_v40, %v76_v37  ;;  %v75_v44 = vld [vmem:[#allocation2 + $0xd0] sm:$0xff]  ;;  %v82_v46 = vld [vmem:[#allocation2 + $0x108] sm:$0xff] }
  0x30   :  { %1369 = vmatprep.subr.bf16.mxu1 %v1368_v30  ;;  %v79_v45 = vld [vmem:[#allocation2 + $0xf0] sm:$0xff]  ;;  %v86_v47 = vld [vmem:[#allocation2 + $0x128] sm:$0xff]  ;;  %v84_v48 = vld [vmem:[#allocation2 + $0x118] sm:$0xff]  ;;  %v1246_v50 = vpack.c.bf16 %v77_v42, %v73_v41 }
  0x31   :  { %v88_v49 = vld [vmem:[#allocation2 + $0x138] sm:$0xff]  ;;  %v1374_v51 = vpack.c.bf16 %v79_v45, %v75_v44  ;;  %v1248_v52 = vpack.c.bf16 %v86_v47, %v82_v46  ;;  %v81_v53 = vld [vmem:[#allocation2 + $0x100] sm:$0xff]  ;;  %v83_v55 = vld [vmem:[#allocation2 + $0x110] sm:$0xff]  ;;  %v1810_v46 = vmov 1983009808  }
  0x32   :  { %1243 = vmatpush1.bf16.msra.mxu0 %v1242_v34  ;;  %v85_v54 = vld [vmem:[#allocation2 + $0x120] sm:$0xff]  ;;  %v1376_v56 = vpack.c.bf16 %v88_v49, %v84_v48  ;;  %v87_v57 = vld [vmem:[#allocation2 + $0x130] sm:$0xff]  ;;  %v90_v58 = vld [vmem:[#allocation2 + $0x148] sm:$0xff]  ;;  %v308_v47 = vunpack.c.l.s4 %v1810_v46  ;;  %v310_v48 = vlaneseq }
  0x33   :  { %1371 = vmatpush1.bf16.msra.mxu1 %v1370_v38  ;;  %1245 = vmatprep.subr.bf16.mxu0 %v1244_v39  ;;  %v94_v59 = vld [vmem:[#allocation2 + $0x168] sm:$0xff]  ;;  %v92_v60 = vld [vmem:[#allocation2 + $0x158] sm:$0xff]  ;;  %v1250_v62 = vpack.c.bf16 %v85_v54, %v81_v53  ;;  %v1378_v63 = vpack.c.bf16 %v87_v57, %v83_v55  ;;  %v89_v1 = vld [vmem:[#allocation2 + $0x140] sm:$0xff] }
  0x34   :  { %1373 = vmatprep.subr.bf16.mxu1 %v1372_v43  ;;  %v96_v61 = vld [vmem:[#allocation2 + $0x178] sm:$0xff]  ;;  %v1252_v0 = vpack.c.bf16 %v94_v59, %v90_v58  ;;  %v93_v2 = vld [vmem:[#allocation2 + $0x160] sm:$0xff]  ;;  %v91_v3 = vld [vmem:[#allocation2 + $0x150] sm:$0xff] }
  0x35   :  { %v1380_v4 = vpack.c.bf16 %v96_v61, %v92_v60  ;;  %v95_v5 = vld [vmem:[#allocation2 + $0x170] sm:$0xff]  ;;  %v98_v6 = vld [vmem:[#allocation2 + $0x188] sm:$0xff]  ;;  %v100_v8 = vld [vmem:[#allocation2 + $0x198] sm:$0xff]  ;;  %v1254_v10 = vpack.c.bf16 %v93_v2, %v89_v1  ;;  %v309_v61 = vunpack.c.0.s8 %v308_v47 }
  0x36   :  { %1247 = vmatpush1.bf16.msra.mxu0 %v1246_v50  ;;  %v102_v7 = vld [vmem:[#allocation2 + $0x1a8] sm:$0xff]  ;;  %v104_v9 = vld [vmem:[#allocation2 + $0x1b8] sm:$0xff]  ;;  %v1382_v11 = vpack.c.bf16 %v95_v5, %v91_v3  ;;  %v97_v13 = vld [vmem:[#allocation2 + $0x180] sm:$0xff] }
  0x37   :  { %1375 = vmatpush1.bf16.msra.mxu1 %v1374_v51  ;;  %1249 = vmatprep.subr.bf16.mxu0 %v1248_v52  ;;  %v1256_v12 = vpack.c.bf16 %v102_v7, %v98_v6  ;;  %v101_v14 = vld [vmem:[#allocation2 + $0x1a0] sm:$0xff]  ;;  %v99_v15 = vld [vmem:[#allocation2 + $0x190] sm:$0xff]  ;;  %v1384_v16 = vpack.c.bf16 %v104_v9, %v100_v8  ;;  %v106_v18 = vld [vmem:[#allocation2 + $0x1c8] sm:$0xff] }
  0x38   :  { %1377 = vmatprep.subr.bf16.mxu1 %v1376_v56  ;;  %v103_v17 = vld [vmem:[#allocation2 + $0x1b0] sm:$0xff]  ;;  %v110_v19 = vld [vmem:[#allocation2 + $0x1e8] sm:$0xff]  ;;  %v108_v20 = vld [vmem:[#allocation2 + $0x1d8] sm:$0xff]  ;;  %v1258_v22 = vpack.c.bf16 %v101_v14, %v97_v13 }
  0x39   :  { %v112_v21 = vld [vmem:[#allocation2 + $0x1f8] sm:$0xff]  ;;  %v1386_v23 = vpack.c.bf16 %v103_v17, %v99_v15  ;;  %v1260_v24 = vpack.c.bf16 %v110_v19, %v106_v18  ;;  %v105_v25 = vld [vmem:[#allocation2 + $0x1c0] sm:$0xff]  ;;  %v107_v27 = vld [vmem:[#allocation2 + $0x1d0] sm:$0xff] }
  0x3a   :  { %1251 = vmatpush1.bf16.msra.mxu0 %v1250_v62  ;;  %v109_v26 = vld [vmem:[#allocation2 + $0x1e0] sm:$0xff]  ;;  %v1388_v28 = vpack.c.bf16 %v112_v21, %v108_v20  ;;  %v111_v29 = vld [vmem:[#allocation2 + $0x1f0] sm:$0xff]  ;;  %v114_v30 = vld [vmem:[#allocation2 + $0x208] sm:$0xff]  ;;  %v311_v62 = vshrl.u32 %v310_v48, 7 }
  0x3b   :  { %1379 = vmatpush1.bf16.msra.mxu1 %v1378_v63  ;;  %1253 = vmatprep.subr.bf16.mxu0 %v1252_v0  ;;  %v118_v31 = vld [vmem:[#allocation2 + $0x228] sm:$0xff]  ;;  %v116_v32 = vld [vmem:[#allocation2 + $0x218] sm:$0xff]  ;;  %v1262_v34 = vpack.c.bf16 %v109_v26, %v105_v25  ;;  %v1390_v35 = vpack.c.bf16 %v111_v29, %v107_v27  ;;  %v113_v37 = vld [vmem:[#allocation2 + $0x200] sm:$0xff] }
  0x3c   :  { %1381 = vmatprep.subr.bf16.mxu1 %v1380_v4  ;;  %v120_v33 = vld [vmem:[#allocation2 + $0x238] sm:$0xff]  ;;  %v1264_v36 = vpack.c.bf16 %v118_v31, %v114_v30  ;;  %v117_v38 = vld [vmem:[#allocation2 + $0x220] sm:$0xff]  ;;  %v115_v39 = vld [vmem:[#allocation2 + $0x210] sm:$0xff] }
  0x3d   :  { %v1392_v40 = vpack.c.bf16 %v120_v33, %v116_v32  ;;  %v119_v41 = vld [vmem:[#allocation2 + $0x230] sm:$0xff]  ;;  %v122_v42 = vld [vmem:[#allocation2 + $0x248] sm:$0xff]  ;;  %v124_v44 = vld [vmem:[#allocation2 + $0x258] sm:$0xff]  ;;  %v1266_v49 = vpack.c.bf16 %v117_v38, %v113_v37 }
  0x3e   :  { %1255 = vmatpush1.bf16.msra.mxu0 %v1254_v10  ;;  %v126_v43 = vld [vmem:[#allocation2 + $0x268] sm:$0xff]  ;;  %v128_v45 = vld [vmem:[#allocation2 + $0x278] sm:$0xff]  ;;  %v1394_v50 = vpack.c.bf16 %v119_v41, %v115_v39  ;;  %v121_v52 = vld [vmem:[#allocation2 + $0x240] sm:$0xff] }
  0x3f   :  { %1383 = vmatpush1.bf16.msra.mxu1 %v1382_v11  ;;  %1257 = vmatprep.subr.bf16.mxu0 %v1256_v12  ;;  %v1268_v51 = vpack.c.bf16 %v126_v43, %v122_v42  ;;  %v125_v53 = vld [vmem:[#allocation2 + $0x260] sm:$0xff]  ;;  %v123_v54 = vld [vmem:[#allocation2 + $0x250] sm:$0xff]  ;;  %v1396_v55 = vpack.c.bf16 %v128_v45, %v124_v44  ;;  %v130_v57 = vld [vmem:[#allocation2 + $0x288] sm:$0xff]  ;;  %v1865_v11 = vsub.s32 %v309_v61, %v311_v62 }
  0x40   :  { %1385 = vmatprep.subr.bf16.mxu1 %v1384_v16  ;;  %v127_v56 = vld [vmem:[#allocation2 + $0x270] sm:$0xff]  ;;  %v134_v58 = vld [vmem:[#allocation2 + $0x2a8] sm:$0xff]  ;;  %v132_v59 = vld [vmem:[#allocation2 + $0x298] sm:$0xff]  ;;  %v1270_v63 = vpack.c.bf16 %v125_v53, %v121_v52 }
  0x41   :  { %v136_v60 = vld [vmem:[#allocation2 + $0x2b8] sm:$0xff]  ;;  %v1398_v0 = vpack.c.bf16 %v127_v56, %v123_v54  ;;  %v1272_v1 = vpack.c.bf16 %v134_v58, %v130_v57  ;;  %v129_v2 = vld [vmem:[#allocation2 + $0x280] sm:$0xff]  ;;  %v131_v4 = vld [vmem:[#allocation2 + $0x290] sm:$0xff] }
  0x42   :  { %1259 = vmatpush1.bf16.msra.mxu0 %v1258_v22  ;;  %v133_v3 = vld [vmem:[#allocation2 + $0x2a0] sm:$0xff]  ;;  %v1400_v5 = vpack.c.bf16 %v136_v60, %v132_v59  ;;  %v135_v6 = vld [vmem:[#allocation2 + $0x2b0] sm:$0xff]  ;;  %v138_v7 = vld [vmem:[#allocation2 + $0x2c8] sm:$0xff] }
  0x43   :  { %1387 = vmatpush1.bf16.msra.mxu1 %v1386_v23  ;;  %1261 = vmatprep.subr.bf16.mxu0 %v1260_v24  ;;  %v142_v8 = vld [vmem:[#allocation2 + $0x2e8] sm:$0xff]  ;;  %v140_v9 = vld [vmem:[#allocation2 + $0x2d8] sm:$0xff]  ;;  %v1274_v12 = vpack.c.bf16 %v133_v3, %v129_v2  ;;  %v137_v13 = vld [vmem:[#allocation2 + $0x2c0] sm:$0xff]  ;;  %v1402_v14 = vpack.c.bf16 %v135_v6, %v131_v4 }
  0x44   :  { %1389 = vmatprep.subr.bf16.mxu1 %v1388_v28  ;;  %v144_v10 = vld [vmem:[#allocation2 + $0x2f8] sm:$0xff]  ;;  %v1276_v15 = vpack.c.bf16 %v142_v8, %v138_v7  ;;  %v141_v16 = vld [vmem:[#allocation2 + $0x2e0] sm:$0xff]  ;;  %v139_v17 = vld [vmem:[#allocation2 + $0x2d0] sm:$0xff] }
  0x45   :  { %v143_v18 = vld [vmem:[#allocation2 + $0x2f0] sm:$0xff]  ;;  %v1404_v19 = vpack.c.bf16 %v144_v10, %v140_v9  ;;  %v146_v20 = vld [vmem:[#allocation2 + $0x308] sm:$0xff]  ;;  %v1870_v22 = vld [vmem:[%s1908_s0] sm:$0xff]  ;;  %v1278_v26 = vpack.c.bf16 %v141_v16, %v137_v13 }
  0x46   :  { %1263 = vmatpush1.bf16.msra.mxu0 %v1262_v34  ;;  %v150_v21 = vld [vmem:[#allocation2 + $0x328] sm:$0xff]  ;;  %v148_v23 = vld [vmem:[#allocation2 + $0x318] sm:$0xff]  ;;  %v1874_v25 = vrot.slane %v1870_v22, %v1865_v11  ;;  %v1406_v27 = vpack.c.bf16 %v143_v18, %v139_v17  ;;  %v145_v29 = vld [vmem:[#allocation2 + $0x300] sm:$0xff]  ;;  %v306_v7 = vcombine.high %v1870_v22, %v1870_v22 }
  0x47   :  { %1391 = vmatpush1.bf16.msra.mxu1 %v1390_v35  ;;  %1265 = vmatprep.subr.bf16.mxu0 %v1264_v36  ;;  %v152_v24 = vld [vmem:[#allocation2 + $0x338] sm:$0xff]  ;;  %v1280_v28 = vpack.c.bf16 %v150_v21, %v146_v20  ;;  %v149_v30 = vld [vmem:[#allocation2 + $0x320] sm:$0xff]  ;;  %v147_v31 = vld [vmem:[#allocation2 + $0x310] sm:$0xff] }
  0x48   :  { %1393 = vmatprep.subr.bf16.mxu1 %v1392_v40  ;;  %v321_v32 = vcombine.high %v1874_v25, %v1874_v25  ;;  %v1408_v33 = vpack.c.bf16 %v152_v24, %v148_v23  ;;  %v151_v34 = vld [vmem:[#allocation2 + $0x330] sm:$0xff]  ;;  %v154_v35 = vld [vmem:[#allocation2 + $0x348] sm:$0xff]  ;;  %v156_v37 = vld [vmem:[#allocation2 + $0x358] sm:$0xff]  ;;  %v1282_v39 = vpack.c.bf16 %v149_v30, %v145_v29  ;;  %v1881_v22 = vrot.slane %v306_v7, %v1865_v11 }
  0x49   :  { %v158_v36 = vld [vmem:[#allocation2 + $0x368] sm:$0xff]  ;;  %v160_v38 = vld [vmem:[#allocation2 + $0x378] sm:$0xff]  ;;  %v1410_v40 = vpack.c.bf16 %v151_v34, %v147_v31  ;;  %v153_v42 = vld [vmem:[#allocation2 + $0x340] sm:$0xff] }
  0x4a   :  { %1267 = vmatpush1.bf16.msra.mxu0 %v1266_v49  ;;  %391 = vmatprep.mubr.f32.mxu0 %v321_v32  ;;  %v1284_v41 = vpack.c.bf16 %v158_v36, %v154_v35  ;;  %v157_v43 = vld [vmem:[#allocation2 + $0x360] sm:$0xff]  ;;  %v155_v44 = vld [vmem:[#allocation2 + $0x350] sm:$0xff]  ;;  %v1412_v45 = vpack.c.bf16 %v160_v38, %v156_v37  ;;  %v162_v47 = vld [vmem:[#allocation2 + $0x388] sm:$0xff]  ;;  %v322_v37 = vcombine.high %v1881_v22, %v1881_v22 }
  0x4b   :  { %1395 = vmatpush1.bf16.msra.mxu1 %v1394_v50  ;;  %1269 = vmatprep.subr.bf16.mxu0 %v1268_v51  ;;  %v159_v46 = vld [vmem:[#allocation2 + $0x370] sm:$0xff]  ;;  %v166_v48 = vld [vmem:[#allocation2 + $0x3a8] sm:$0xff]  ;;  %v164_v49 = vld [vmem:[#allocation2 + $0x398] sm:$0xff]  ;;  %v1286_v51 = vpack.c.bf16 %v157_v43, %v153_v42 }
  0x4c   :  { %1397 = vmatprep.subr.bf16.mxu1 %v1396_v55  ;;  %533 = vmatprep.mubr.f32.mxu1 %v321_v32  ;;  %v168_v50 = vld [vmem:[#allocation2 + $0x3b8] sm:$0xff]  ;;  %v1414_v52 = vpack.c.bf16 %v159_v46, %v155_v44  ;;  %v1288_v53 = vpack.c.bf16 %v166_v48, %v162_v47  ;;  %v161_v54 = vld [vmem:[#allocation2 + $0x380] sm:$0xff]  ;;  %v163_v56 = vld [vmem:[#allocation2 + $0x390] sm:$0xff] }
  0x4d   :  { %v165_v55 = vld [vmem:[#allocation2 + $0x3a0] sm:$0xff]  ;;  %v1416_v57 = vpack.c.bf16 %v168_v50, %v164_v49  ;;  %v167_v58 = vld [vmem:[#allocation2 + $0x3b0] sm:$0xff]  ;;  %v170_v59 = vld [vmem:[#allocation2 + $0x3c8] sm:$0xff] }
  0x4e   :  { %1271 = vmatpush1.bf16.msra.mxu0 %v1270_v63  ;;  %v174_v60 = vld [vmem:[#allocation2 + $0x3e8] sm:$0xff]  ;;  %v172_v61 = vld [vmem:[#allocation2 + $0x3d8] sm:$0xff]  ;;  %v1290_v63 = vpack.c.bf16 %v165_v55, %v161_v54  ;;  %v169_v2 = vld [vmem:[#allocation2 + $0x3c0] sm:$0xff] }
  0x4f   :  { %1399 = vmatpush1.bf16.msra.mxu1 %v1398_v0  ;;  %1273 = vmatprep.subr.bf16.mxu0 %v1272_v1  ;;  %v176_v62 = vld [vmem:[#allocation2 + $0x3f8] sm:$0xff]  ;;  %v1418_v0 = vpack.c.bf16 %v167_v58, %v163_v56  ;;  %v1292_v1 = vpack.c.bf16 %v174_v60, %v170_v59  ;;  %v173_v3 = vld [vmem:[#allocation2 + $0x3e0] sm:$0xff]  ;;  %v171_v4 = vld [vmem:[#allocation2 + $0x3d0] sm:$0xff] }
  0x50   :  { %1401 = vmatprep.subr.bf16.mxu1 %v1400_v5  ;;  %v1420_v5 = vpack.c.bf16 %v176_v62, %v172_v61  ;;  %v175_v6 = vld [vmem:[#allocation2 + $0x3f0] sm:$0xff]  ;;  %v178_v8 = vld [vmem:[#allocation2 + $0x408] sm:$0xff]  ;;  %v180_v10 = vld [vmem:[#allocation2 + $0x418] sm:$0xff]  ;;  %v1294_v13 = vpack.c.bf16 %v173_v3, %v169_v2 }
  0x51   :  { %v182_v9 = vld [vmem:[#allocation2 + $0x428] sm:$0xff]  ;;  %v177_v16 = vld [vmem:[#allocation2 + $0x400] sm:$0xff]  ;;  %v179_v18 = vld [vmem:[#allocation2 + $0x410] sm:$0xff] }
  0x52   :  { %1275 = vmatpush1.bf16.msra.mxu0 %v1274_v12  ;;  %v184_v12 = vld [vmem:[#allocation2 + $0x438] sm:$0xff]  ;;  %v181_v17 = vld [vmem:[#allocation2 + $0x420] sm:$0xff]  ;;  %v183_v20 = vld [vmem:[#allocation2 + $0x430] sm:$0xff] }
  0x53   :  { %1403 = vmatpush1.bf16.msra.mxu1 %v1402_v14  ;;  %1277 = vmatprep.subr.bf16.mxu0 %v1276_v15  ;;  %v1422_v14 = vpack.c.bf16 %v175_v6, %v171_v4  ;;  %v1296_v15 = vpack.c.bf16 %v182_v9, %v178_v8  ;;  %v186_v21 = vld [vmem:[#allocation2 + $0x448] sm:$0xff]  ;;  %v188_v24 = vld [vmem:[#allocation2 + $0x458] sm:$0xff]  ;;  %v185_v30 = vld [vmem:[#allocation2 + $0x440] sm:$0xff] }
  0x54   :  { %1405 = vmatprep.subr.bf16.mxu1 %v1404_v19  ;;  %v1424_v19 = vpack.c.bf16 %v184_v12, %v180_v10  ;;  %v190_v23 = vld [vmem:[#allocation2 + $0x468] sm:$0xff]  ;;  %v189_v31 = vld [vmem:[#allocation2 + $0x460] sm:$0xff]  ;;  %v187_v32 = vld [vmem:[#allocation2 + $0x450] sm:$0xff] }
  0x55   :  { %v1300_v29 = vpack.c.bf16 %v190_v23, %v186_v21  ;;  %v191_v34 = vld [vmem:[#allocation2 + $0x470] sm:$0xff]  ;;  %v194_v35 = vld [vmem:[#allocation2 + $0x488] sm:$0xff]  ;;  %v196_v38 = vld [vmem:[#allocation2 + $0x498] sm:$0xff] }
  0x56   :  { %1279 = vmatpush1.bf16.msra.mxu0 %v1278_v26  ;;  %v192_v26 = vld [vmem:[#allocation2 + $0x478] sm:$0xff]  ;;  %v198_v36 = vld [vmem:[#allocation2 + $0x4a8] sm:$0xff]  ;;  %v193_v43 = vld [vmem:[#allocation2 + $0x480] sm:$0xff] }
  0x57   :  { %1407 = vmatpush1.bf16.msra.mxu1 %v1406_v27  ;;  %1281 = vmatprep.subr.bf16.mxu0 %v1280_v28  ;;  %v1298_v27 = vpack.c.bf16 %v181_v17, %v177_v16  ;;  %v1426_v28 = vpack.c.bf16 %v183_v20, %v179_v18  ;;  %v1304_v42 = vpack.c.bf16 %v198_v36, %v194_v35  ;;  %v197_v44 = vld [vmem:[#allocation2 + $0x4a0] sm:$0xff]  ;;  %v199_v47 = vld [vmem:[#allocation2 + $0x4b0] sm:$0xff]  ;;  %v202_v48 = vld [vmem:[#allocation2 + $0x4c8] sm:$0xff] }
  0x58   :  { %1409 = vmatprep.subr.bf16.mxu1 %v1408_v33  ;;  %v1428_v33 = vpack.c.bf16 %v192_v26, %v188_v24  ;;  %v206_v49 = vld [vmem:[#allocation2 + $0x4e8] sm:$0xff]  ;;  %v204_v50 = vld [vmem:[#allocation2 + $0x4d8] sm:$0xff]  ;;  %v201_v54 = vld [vmem:[#allocation2 + $0x4c0] sm:$0xff] }
  0x59   :  { %v205_v55 = vld [vmem:[#allocation2 + $0x4e0] sm:$0xff]  ;;  %v203_v56 = vld [vmem:[#allocation2 + $0x4d0] sm:$0xff]  ;;  %v210_v59 = vld [vmem:[#allocation2 + $0x508] sm:$0xff] }
  0x5a   :  { %1283 = vmatpush1.bf16.msra.mxu0 %v1282_v39  ;;  %v200_v39 = vld [vmem:[#allocation2 + $0x4b8] sm:$0xff]  ;;  %v207_v58 = vld [vmem:[#allocation2 + $0x4f0] sm:$0xff]  ;;  %v214_v60 = vld [vmem:[#allocation2 + $0x528] sm:$0xff] }
  0x5b   :  { %1411 = vmatpush1.bf16.msra.mxu1 %v1410_v40  ;;  %1285 = vmatprep.subr.bf16.mxu0 %v1284_v41  ;;  %v1302_v40 = vpack.c.bf16 %v189_v31, %v185_v30  ;;  %v1430_v41 = vpack.c.bf16 %v191_v34, %v187_v32  ;;  %v1432_v46 = vpack.c.bf16 %v200_v39, %v196_v38  ;;  %v212_v61 = vld [vmem:[#allocation2 + $0x518] sm:$0xff]  ;;  %v209_v2 = vld [vmem:[#allocation2 + $0x500] sm:$0xff]  ;;  %v211_v4 = vld [vmem:[#allocation2 + $0x510] sm:$0xff] }
  0x5c   :  { %1413 = vmatprep.subr.bf16.mxu1 %v1412_v45  ;;  %v195_v45 = vld [vmem:[#allocation2 + $0x490] sm:$0xff]  ;;  %v216_v62 = vld [vmem:[#allocation2 + $0x538] sm:$0xff]  ;;  %v213_v3 = vld [vmem:[#allocation2 + $0x520] sm:$0xff] }
  0x5d   :  { %v215_v6 = vld [vmem:[#allocation2 + $0x530] sm:$0xff]  ;;  %v218_v7 = vld [vmem:[#allocation2 + $0x548] sm:$0xff]  ;;  %v220_v9 = vld [vmem:[#allocation2 + $0x558] sm:$0xff]  ;;  %v1314_v12 = vpack.c.bf16 %v213_v3, %v209_v2 }
  0x5e   :  { %1287 = vmatpush1.bf16.msra.mxu0 %v1286_v51  ;;  %v208_v51 = vld [vmem:[#allocation2 + $0x4f8] sm:$0xff]  ;;  %v222_v8 = vld [vmem:[#allocation2 + $0x568] sm:$0xff]  ;;  %v221_v16 = vld [vmem:[#allocation2 + $0x560] sm:$0xff] }
  0x5f   :  { %1415 = vmatpush1.bf16.msra.mxu1 %v1414_v52  ;;  %1289 = vmatprep.subr.bf16.mxu0 %v1288_v53  ;;  %v1306_v52 = vpack.c.bf16 %v197_v44, %v193_v43  ;;  %v1308_v53 = vpack.c.bf16 %v206_v49, %v202_v48  ;;  %v224_v10 = vld [vmem:[#allocation2 + $0x578] sm:$0xff]  ;;  %v219_v17 = vld [vmem:[#allocation2 + $0x550] sm:$0xff]  ;;  %v226_v20 = vld [vmem:[#allocation2 + $0x588] sm:$0xff] }
  0x60   :  { %1417 = vmatprep.subr.bf16.mxu1 %v1416_v57  ;;  %v1436_v57 = vpack.c.bf16 %v208_v51, %v204_v50  ;;  %v1444_v18 = vpack.c.bf16 %v224_v10, %v220_v9  ;;  %v230_v21 = vld [vmem:[#allocation2 + $0x5a8] sm:$0xff]  ;;  %v228_v23 = vld [vmem:[#allocation2 + $0x598] sm:$0xff]  ;;  %v229_v30 = vld [vmem:[#allocation2 + $0x5a0] sm:$0xff] }
  0x61   :  { %v232_v24 = vld [vmem:[#allocation2 + $0x5b8] sm:$0xff]  ;;  %v227_v31 = vld [vmem:[#allocation2 + $0x590] sm:$0xff]  ;;  %v234_v34 = vld [vmem:[#allocation2 + $0x5c8] sm:$0xff] }
  0x62   :  { %1291 = vmatpush1.bf16.msra.mxu0 %v1290_v63  ;;  %v1310_v63 = vpack.c.bf16 %v205_v55, %v201_v54  ;;  %v1448_v32 = vpack.c.bf16 %v232_v24, %v228_v23  ;;  %v238_v35 = vld [vmem:[#allocation2 + $0x5e8] sm:$0xff]  ;;  %v236_v36 = vld [vmem:[#allocation2 + $0x5d8] sm:$0xff]  ;;  %v235_v43 = vld [vmem:[#allocation2 + $0x5d0] sm:$0xff] }
  0x63   :  { %1419 = vmatpush1.bf16.msra.mxu1 %v1418_v0  ;;  %1293 = vmatprep.subr.bf16.mxu0 %v1292_v1  ;;  %v1438_v0 = vpack.c.bf16 %v207_v58, %v203_v56  ;;  %v1312_v1 = vpack.c.bf16 %v214_v60, %v210_v59  ;;  %v244_v48 = vld [vmem:[#allocation2 + $0x618] sm:$0xff]  ;;  %v243_v54 = vld [vmem:[#allocation2 + $0x610] sm:$0xff]  ;;  %v254_v58 = vld [vmem:[#allocation2 + $0x668] sm:$0xff] }
  0x64   :  { %1421 = vmatprep.subr.bf16.mxu1 %v1420_v5  ;;  %v1440_v5 = vpack.c.bf16 %v216_v62, %v212_v61  ;;  %v248_v49 = vld [vmem:[#allocation2 + $0x638] sm:$0xff]  ;;  %v247_v56 = vld [vmem:[#allocation2 + $0x630] sm:$0xff] }
  0x65   :  { %v1456_v55 = vpack.c.bf16 %v248_v49, %v244_v48  ;;  %v252_v59 = vld [vmem:[#allocation2 + $0x658] sm:$0xff]  ;;  %v1458_v62 = vpack.c.bf16 %v247_v56, %v243_v54  ;;  %v251_v2 = vld [vmem:[#allocation2 + $0x650] sm:$0xff]  ;;  %v294_v56 = vld [vmem:[#allocation2 + $0x7a8] sm:$0xff] }
  0x66   :  { %1295 = vmatpush1.bf16.msra.mxu0 %v1294_v13  ;;  %v1442_v13 = vpack.c.bf16 %v215_v6, %v211_v4  ;;  %v256_v60 = vld [vmem:[#allocation2 + $0x678] sm:$0xff]  ;;  %v255_v4 = vld [vmem:[#allocation2 + $0x670] sm:$0xff]  ;;  %v262_v6 = vld [vmem:[#allocation2 + $0x6a8] sm:$0xff] }
  0x67   :  { %1423 = vmatpush1.bf16.msra.mxu1 %v1422_v14  ;;  %1297 = vmatprep.subr.bf16.mxu0 %v1296_v15  ;;  %v1316_v14 = vpack.c.bf16 %v222_v8, %v218_v7  ;;  %v217_v15 = vld [vmem:[#allocation2 + $0x540] sm:$0xff]  ;;  %v1460_v3 = vpack.c.bf16 %v256_v60, %v252_v59  ;;  %v260_v7 = vld [vmem:[#allocation2 + $0x698] sm:$0xff]  ;;  %v1462_v10 = vpack.c.bf16 %v255_v4, %v251_v2  ;;  %v287_v54 = vld [vmem:[#allocation2 + $0x770] sm:$0xff] }
  0x68   :  { %1425 = vmatprep.subr.bf16.mxu1 %v1424_v19  ;;  %v223_v19 = vld [vmem:[#allocation2 + $0x570] sm:$0xff]  ;;  %v1318_v26 = vpack.c.bf16 %v221_v16, %v217_v15  ;;  %v264_v8 = vld [vmem:[#allocation2 + $0x6b8] sm:$0xff]  ;;  %v302_v4 = vld [vmem:[#allocation2 + $0x7e8] sm:$0xff] }
  0x69   :  { %392 = vmatmul.mubr.f32.vlgmr.msra.gmra.mrb[0].mxu0 %v1874_v25  ;;  %v259_v15 = vld [vmem:[#allocation2 + $0x690] sm:$0xff]  ;;  %v1464_v16 = vpack.c.bf16 %v264_v8, %v260_v7 }
  0x6a   :  { %1299 = vmatpush1.bf16.msra.mxu0 %v1298_v27  ;;  %534 = vmatmul.mubr.f32.vlgmr.msra.gmra.mrb[0].mxu1 %v1874_v25  ;;  %v1434_v25 = vpack.c.bf16 %v199_v47, %v195_v45  ;;  %v1446_v27 = vpack.c.bf16 %v223_v19, %v219_v17  ;;  %v239_v45 = vld [vmem:[#allocation2 + $0x5f0] sm:$0xff]  ;;  %v246_v47 = vld [vmem:[#allocation2 + $0x628] sm:$0xff] }
  0x6b   :  { %1427 = vmatpush1.bf16.msra.mxu1 %v1426_v28  ;;  %1301 = vmatprep.subr.bf16.mxu0 %v1300_v29  ;;  %v1320_v28 = vpack.c.bf16 %v230_v21, %v226_v20  ;;  %v225_v29 = vld [vmem:[#allocation2 + $0x580] sm:$0xff]  ;;  %v1454_v51 = vpack.c.bf16 %v239_v45, %v235_v43  ;;  %v263_v17 = vld [vmem:[#allocation2 + $0x6b0] sm:$0xff]  ;;  %v270_v19 = vld [vmem:[#allocation2 + $0x6e8] sm:$0xff] }
  0x6c   :  { %1429 = vmatprep.subr.bf16.mxu1 %v1428_v33  ;;  %462 = vmatprep.mubr.f32.mxu0 %v322_v37  ;;  %v231_v33 = vld [vmem:[#allocation2 + $0x5b0] sm:$0xff]  ;;  %v1322_v38 = vpack.c.bf16 %v229_v30, %v225_v29  ;;  %v268_v20 = vld [vmem:[#allocation2 + $0x6d8] sm:$0xff]  ;;  %v1466_v24 = vpack.c.bf16 %v263_v17, %v259_v15  ;;  %v286_v45 = vld [vmem:[#allocation2 + $0x768] sm:$0xff] }
  0x6d   :  { %604 = vmatprep.mubr.f32.mxu1 %v322_v37  ;;  %v240_v37 = vld [vmem:[#allocation2 + $0x5f8] sm:$0xff]  ;;  %v1450_v39 = vpack.c.bf16 %v231_v33, %v227_v31  ;;  %v267_v29 = vld [vmem:[#allocation2 + $0x6d0] sm:$0xff]  ;;  %v278_v33 = vld [vmem:[#allocation2 + $0x728] sm:$0xff] }
  0x6e   :  { %1303 = vmatpush1.bf16.msra.mxu0 %v1302_v40  ;;  %v1324_v40 = vpack.c.bf16 %v238_v35, %v234_v34  ;;  %v1452_v44 = vpack.c.bf16 %v240_v37, %v236_v36  ;;  %v272_v21 = vld [vmem:[#allocation2 + $0x6f8] sm:$0xff]  ;;  %v271_v31 = vld [vmem:[#allocation2 + $0x6f0] sm:$0xff]  ;;  %v668_v17 = vld [vmem:[#allocation4 + $0x28] sm:$0xff] }
  0x6f   :  { %1431 = vmatpush1.bf16.msra.mxu1 %v1430_v41  ;;  %1305 = vmatprep.subr.bf16.mxu0 %v1304_v42  ;;  %v233_v41 = vld [vmem:[#allocation2 + $0x5c0] sm:$0xff]  ;;  %v1468_v30 = vpack.c.bf16 %v272_v21, %v268_v20  ;;  %v276_v34 = vld [vmem:[#allocation2 + $0x718] sm:$0xff]  ;;  %v1470_v37 = vpack.c.bf16 %v271_v31, %v267_v29  ;;  %v279_v43 = vld [vmem:[#allocation2 + $0x730] sm:$0xff] }
  0x70   :  { %1433 = vmatprep.subr.bf16.mxu1 %v1432_v46  ;;  %v237_v42 = vld [vmem:[#allocation2 + $0x5e0] sm:$0xff]  ;;  %v242_v46 = vld [vmem:[#allocation2 + $0x608] sm:$0xff]  ;;  %v280_v35 = vld [vmem:[#allocation2 + $0x738] sm:$0xff] }
  0x71   :  { %v1326_v50 = vpack.c.bf16 %v237_v42, %v233_v41  ;;  %v275_v41 = vld [vmem:[#allocation2 + $0x710] sm:$0xff]  ;;  %v1472_v42 = vpack.c.bf16 %v280_v35, %v276_v34  ;;  %v676_v31 = vld [vmem:[#allocation4 + $0x68] sm:$0xff] }
  0x72   :  { %1307 = vmatpush1.bf16.msra.mxu0 %v1306_v52  ;;  %v1328_v52 = vpack.c.bf16 %v246_v47, %v242_v46  ;;  %v284_v46 = vld [vmem:[#allocation2 + $0x758] sm:$0xff]  ;;  %v1474_v49 = vpack.c.bf16 %v279_v43, %v275_v41  ;;  %v295_v2 = vld [vmem:[#allocation2 + $0x7b0] sm:$0xff]  ;;  %v684_v43 = vld [vmem:[#allocation4 + $0xa8] sm:$0xff] }
  0x73   :  { %1435 = vmatpush1.bf16.msra.mxu1 %v1434_v25  ;;  %1309 = vmatprep.subr.bf16.mxu0 %v1308_v53  ;;  %v241_v25 = vld [vmem:[#allocation2 + $0x600] sm:$0xff]  ;;  %v288_v47 = vld [vmem:[#allocation2 + $0x778] sm:$0xff]  ;;  %v303_v15 = vld [vmem:[#allocation2 + $0x7f0] sm:$0xff] }
  0x74   :  { %1437 = vmatprep.subr.bf16.mxu1 %v1436_v57  ;;  %v245_v53 = vld [vmem:[#allocation2 + $0x620] sm:$0xff]  ;;  %v250_v57 = vld [vmem:[#allocation2 + $0x648] sm:$0xff]  ;;  %v669_v29 = vld [vmem:[#allocation4 + $0x30] sm:$0xff] }
  0x75   :  { %v1330_v61 = vpack.c.bf16 %v245_v53, %v241_v25  ;;  %v283_v25 = vld [vmem:[#allocation2 + $0x750] sm:$0xff]  ;;  %v1476_v53 = vpack.c.bf16 %v288_v47, %v284_v46 }
  0x76   :  { %1311 = vmatpush1.bf16.msra.mxu0 %v1310_v63  ;;  %v1332_v63 = vpack.c.bf16 %v254_v58, %v250_v57  ;;  %v292_v57 = vld [vmem:[#allocation2 + $0x798] sm:$0xff]  ;;  %v1478_v60 = vpack.c.bf16 %v287_v54, %v283_v25  ;;  %v677_v41 = vld [vmem:[#allocation4 + $0x70] sm:$0xff]  ;;  %v692_v54 = vld [vmem:[#allocation4 + $0xe8] sm:$0xff] }
  0x77   :  { %1439 = vmatpush1.bf16.msra.mxu1 %v1438_v0  ;;  %1313 = vmatprep.subr.bf16.mxu0 %v1312_v1  ;;  %v249_v0 = vld [vmem:[#allocation2 + $0x640] sm:$0xff]  ;;  %v296_v58 = vld [vmem:[#allocation2 + $0x7b8] sm:$0xff]  ;;  %v685_v25 = vld [vmem:[#allocation4 + $0xb0] sm:$0xff] }
  0x78   :  { %1441 = vmatprep.subr.bf16.mxu1 %v1440_v5  ;;  %v253_v1 = vld [vmem:[#allocation2 + $0x660] sm:$0xff]  ;;  %v258_v5 = vld [vmem:[#allocation2 + $0x688] sm:$0xff] }
  0x79   :  { %v1334_v9 = vpack.c.bf16 %v253_v1, %v249_v0  ;;  %v291_v0 = vld [vmem:[#allocation2 + $0x790] sm:$0xff]  ;;  %v1480_v1 = vpack.c.bf16 %v296_v58, %v292_v57 }
  0x7a   :  { %1315 = vmatpush1.bf16.msra.mxu0 %v1314_v12  ;;  %v1336_v12 = vpack.c.bf16 %v262_v6, %v258_v5  ;;  %v300_v5 = vld [vmem:[#allocation2 + $0x7d8] sm:$0xff]  ;;  %v1482_v8 = vpack.c.bf16 %v295_v2, %v291_v0  ;;  %v696_v0 = vld [vmem:[#allocation4 + $0x108] sm:$0xff] }
  0x7b   :  { %1443 = vmatpush1.bf16.msra.mxu1 %v1442_v13  ;;  %1317 = vmatprep.subr.bf16.mxu0 %v1316_v14  ;;  %v257_v13 = vld [vmem:[#allocation2 + $0x680] sm:$0xff]  ;;  %v304_v6 = vld [vmem:[#allocation2 + $0x7f8] sm:$0xff] }
  0x7c   :  { %1445 = vmatprep.subr.bf16.mxu1 %v1444_v18  ;;  %v261_v14 = vld [vmem:[#allocation2 + $0x6a0] sm:$0xff]  ;;  %v266_v18 = vld [vmem:[#allocation2 + $0x6c8] sm:$0xff]  ;;  %v698_v2 = vld [vmem:[#allocation4 + $0x118] sm:$0xff] }
  0x7d   :  { %v1338_v23 = vpack.c.bf16 %v261_v14, %v257_v13  ;;  %v299_v13 = vld [vmem:[#allocation2 + $0x7d0] sm:$0xff]  ;;  %v1484_v14 = vpack.c.bf16 %v304_v6, %v300_v5 }
  0x7e   :  { %1319 = vmatpush1.bf16.msra.mxu0 %v1318_v26  ;;  %v1340_v26 = vpack.c.bf16 %v270_v19, %v266_v18  ;;  %v666_v18 = vld [vmem:[#allocation4 + $0x18] sm:$0xff]  ;;  %v1486_v21 = vpack.c.bf16 %v303_v15, %v299_v13  ;;  %v704_v13 = vld [vmem:[#allocation4 + $0x148] sm:$0xff] }
  0x7f   :  { %1447 = vmatpush1.bf16.msra.mxu1 %v1446_v27  ;;  %1321 = vmatprep.subr.bf16.mxu0 %v1320_v28  ;;  %v265_v27 = vld [vmem:[#allocation2 + $0x6c0] sm:$0xff]  ;;  %v670_v19 = vld [vmem:[#allocation4 + $0x38] sm:$0xff] }
  0x80   :  { %1449 = vmatprep.subr.bf16.mxu1 %v1448_v32  ;;  %v269_v28 = vld [vmem:[#allocation2 + $0x6e0] sm:$0xff]  ;;  %v274_v32 = vld [vmem:[#allocation2 + $0x708] sm:$0xff]  ;;  %v706_v15 = vld [vmem:[#allocation4 + $0x158] sm:$0xff] }
  0x81   :  { %v1342_v36 = vpack.c.bf16 %v269_v28, %v265_v27  ;;  %v665_v27 = vld [vmem:[#allocation4 + $0x10] sm:$0xff]  ;;  %v1616_v28 = vpack.c.bf16 %v670_v19, %v666_v18 }
  0x82   :  { %1323 = vmatpush1.bf16.msra.mxu0 %v1322_v38  ;;  %v1344_v38 = vpack.c.bf16 %v278_v33, %v274_v32  ;;  %v674_v32 = vld [vmem:[#allocation4 + $0x58] sm:$0xff]  ;;  %v1618_v35 = vpack.c.bf16 %v669_v29, %v665_v27  ;;  %v712_v27 = vld [vmem:[#allocation4 + $0x188] sm:$0xff] }
  0x83   :  { %1451 = vmatpush1.bf16.msra.mxu1 %v1450_v39  ;;  %1325 = vmatprep.subr.bf16.mxu0 %v1324_v40  ;;  %v273_v39 = vld [vmem:[#allocation2 + $0x700] sm:$0xff]  ;;  %v678_v33 = vld [vmem:[#allocation4 + $0x78] sm:$0xff] }
  0x84   :  { %1453 = vmatprep.subr.bf16.mxu1 %v1452_v44  ;;  %v277_v40 = vld [vmem:[#allocation2 + $0x720] sm:$0xff]  ;;  %v282_v44 = vld [vmem:[#allocation2 + $0x748] sm:$0xff]  ;;  %v714_v29 = vld [vmem:[#allocation4 + $0x198] sm:$0xff] }
  0x85   :  { %v1346_v48 = vpack.c.bf16 %v277_v40, %v273_v39  ;;  %v673_v39 = vld [vmem:[#allocation4 + $0x50] sm:$0xff]  ;;  %v1620_v40 = vpack.c.bf16 %v678_v33, %v674_v32 }
  0x86   :  { %1327 = vmatpush1.bf16.msra.mxu0 %v1326_v50  ;;  %v1348_v50 = vpack.c.bf16 %v286_v45, %v282_v44  ;;  %v682_v44 = vld [vmem:[#allocation4 + $0x98] sm:$0xff]  ;;  %v1622_v47 = vpack.c.bf16 %v677_v41, %v673_v39  ;;  %v720_v39 = vld [vmem:[#allocation4 + $0x1c8] sm:$0xff] }
  0x87   :  { %1455 = vmatpush1.bf16.msra.mxu1 %v1454_v51  ;;  %1329 = vmatprep.subr.bf16.mxu0 %v1328_v52  ;;  %v281_v51 = vld [vmem:[#allocation2 + $0x740] sm:$0xff]  ;;  %v686_v45 = vld [vmem:[#allocation4 + $0xb8] sm:$0xff] }
  0x88   :  { %1457 = vmatprep.subr.bf16.mxu1 %v1456_v55  ;;  %v285_v52 = vld [vmem:[#allocation2 + $0x760] sm:$0xff]  ;;  %v290_v55 = vld [vmem:[#allocation2 + $0x788] sm:$0xff]  ;;  %v722_v41 = vld [vmem:[#allocation4 + $0x1d8] sm:$0xff] }
  0x89   :  { %v1350_v59 = vpack.c.bf16 %v285_v52, %v281_v51  ;;  %v681_v51 = vld [vmem:[#allocation4 + $0x90] sm:$0xff]  ;;  %v1624_v52 = vpack.c.bf16 %v686_v45, %v682_v44 }
  0x8a   :  { %1331 = vmatpush1.bf16.msra.mxu0 %v1330_v61  ;;  %v1352_v61 = vpack.c.bf16 %v294_v56, %v290_v55  ;;  %v690_v55 = vld [vmem:[#allocation4 + $0xd8] sm:$0xff] }
  0x8b   :  { %1459 = vmatpush1.bf16.msra.mxu1 %v1458_v62  ;;  %1333 = vmatprep.subr.bf16.mxu0 %v1332_v63  ;;  %v289_v62 = vld [vmem:[#allocation2 + $0x780] sm:$0xff]  ;;  %v694_v56 = vld [vmem:[#allocation4 + $0xf8] sm:$0xff] }
  0x8c   :  { %1461 = vmatprep.subr.bf16.mxu1 %v1460_v3  ;;  %v293_v63 = vld [vmem:[#allocation2 + $0x7a0] sm:$0xff]  ;;  %v298_v3 = vld [vmem:[#allocation2 + $0x7c8] sm:$0xff] }
  0x8d   :  { %v1354_v7 = vpack.c.bf16 %v293_v63, %v289_v62  ;;  %v1628_v62 = vpack.c.bf16 %v694_v56, %v690_v55  ;;  %v693_v63 = vld [vmem:[#allocation4 + $0xf0] sm:$0xff] }
  0x8e   :  { %1335 = vmatpush1.bf16.msra.mxu0 %v1334_v9  ;;  %v1356_v9 = vpack.c.bf16 %v302_v4, %v298_v3  ;;  %v702_v3 = vld [vmem:[#allocation4 + $0x138] sm:$0xff] }
  0x8f   :  { %1463 = vmatpush1.bf16.msra.mxu1 %v1462_v10  ;;  %1337 = vmatprep.subr.bf16.mxu0 %v1336_v12  ;;  %v297_v10 = vld [vmem:[#allocation2 + $0x7c0] sm:$0xff] }
  0x90   :  { %1465 = vmatprep.subr.bf16.mxu1 %v1464_v16  ;;  %v301_v12 = vld [vmem:[#allocation2 + $0x7e0] sm:$0xff]  ;;  %v664_v16 = vld [vmem:[#allocation4 + $0x8] sm:$0xff] }
  0x91   :  { %v1358_v20 = vpack.c.bf16 %v301_v12, %v297_v10  ;;  %v1632_v10 = vpack.c.bf16 %v702_v3, %v698_v2  ;;  %v701_v12 = vld [vmem:[#allocation4 + $0x130] sm:$0xff] }
  0x92   :  { %1339 = vmatpush1.bf16.msra.mxu0 %v1338_v23  ;;  %v1488_v23 = vpack.c.bf16 %v668_v17, %v664_v16  ;;  %v710_v16 = vld [vmem:[#allocation4 + $0x178] sm:$0xff] }
  0x93   :  { %1467 = vmatpush1.bf16.msra.mxu1 %v1466_v24  ;;  %1341 = vmatprep.subr.bf16.mxu0 %v1340_v26  ;;  %v663_v24 = vld [vmem:[#allocation4] sm:$0xff] }
  0x94   :  { %1469 = vmatprep.subr.bf16.mxu1 %v1468_v30  ;;  %v667_v26 = vld [vmem:[#allocation4 + $0x20] sm:$0xff]  ;;  %v672_v30 = vld [vmem:[#allocation4 + $0x48] sm:$0xff] }
  0x95   :  { %v1490_v34 = vpack.c.bf16 %v667_v26, %v663_v24  ;;  %v1636_v24 = vpack.c.bf16 %v710_v16, %v706_v15  ;;  %v709_v26 = vld [vmem:[#allocation4 + $0x170] sm:$0xff] }
  0x96   :  { %1343 = vmatpush1.bf16.msra.mxu0 %v1342_v36  ;;  %v1492_v36 = vpack.c.bf16 %v676_v31, %v672_v30  ;;  %v718_v30 = vld [vmem:[#allocation4 + $0x1b8] sm:$0xff] }
  0x97   :  { %1471 = vmatpush1.bf16.msra.mxu1 %v1470_v37  ;;  %1345 = vmatprep.subr.bf16.mxu0 %v1344_v38  ;;  %v671_v37 = vld [vmem:[#allocation4 + $0x40] sm:$0xff] }
  0x98   :  { %1473 = vmatprep.subr.bf16.mxu1 %v1472_v42  ;;  %v675_v38 = vld [vmem:[#allocation4 + $0x60] sm:$0xff]  ;;  %v680_v42 = vld [vmem:[#allocation4 + $0x88] sm:$0xff] }
  0x99   :  { %v1494_v46 = vpack.c.bf16 %v675_v38, %v671_v37  ;;  %v1640_v37 = vpack.c.bf16 %v718_v30, %v714_v29  ;;  %v717_v38 = vld [vmem:[#allocation4 + $0x1b0] sm:$0xff] }
  0x9a   :  { %1347 = vmatpush1.bf16.msra.mxu0 %v1346_v48  ;;  %v1496_v48 = vpack.c.bf16 %v684_v43, %v680_v42  ;;  %v726_v42 = vld [vmem:[#allocation4 + $0x1f8] sm:$0xff] }
  0x9b   :  { %1475 = vmatpush1.bf16.msra.mxu1 %v1474_v49  ;;  %1349 = vmatprep.subr.bf16.mxu0 %v1348_v50  ;;  %v679_v49 = vld [vmem:[#allocation4 + $0x80] sm:$0xff] }
  0x9c   :  { %1477 = vmatprep.subr.bf16.mxu1 %v1476_v53  ;;  %v683_v50 = vld [vmem:[#allocation4 + $0xa0] sm:$0xff]  ;;  %v688_v53 = vld [vmem:[#allocation4 + $0xc8] sm:$0xff] }
  0x9d   :  { %v1498_v57 = vpack.c.bf16 %v683_v50, %v679_v49  ;;  %v1500_v58 = vpack.c.bf16 %v692_v54, %v688_v53  ;;  %v1644_v49 = vpack.c.bf16 %v726_v42, %v722_v41  ;;  %v725_v50 = vld [vmem:[#allocation4 + $0x1f0] sm:$0xff]  ;;  %v734_v53 = vld [vmem:[#allocation4 + $0x238] sm:$0xff] }
  0x9e   :  { %1351 = vmatpush1.bf16.msra.mxu0 %v1350_v59  ;;  %v687_v59 = vld [vmem:[#allocation4 + $0xc0] sm:$0xff]  ;;  %v766_v42 = vld [vmem:[#allocation4 + $0x338] sm:$0xff] }
  0x9f   :  { %1479 = vmatpush1.bf16.msra.mxu1 %v1478_v60  ;;  %1353 = vmatprep.subr.bf16.mxu0 %v1352_v61  ;;  %v691_v60 = vld [vmem:[#allocation4 + $0xe0] sm:$0xff]  ;;  %v689_v61 = vld [vmem:[#allocation4 + $0xd0] sm:$0xff] }
  0xa0   :  { %1481 = vmatprep.subr.bf16.mxu1 %v1480_v1  ;;  %v700_v1 = vld [vmem:[#allocation4 + $0x128] sm:$0xff]  ;;  %v1502_v4 = vpack.c.bf16 %v691_v60, %v687_v59  ;;  %v1630_v5 = vpack.c.bf16 %v693_v63, %v689_v61  ;;  %v733_v60 = vld [vmem:[#allocation4 + $0x230] sm:$0xff]  ;;  %v738_v63 = vld [vmem:[#allocation4 + $0x258] sm:$0xff] }
  0xa1   :  { %v1504_v6 = vpack.c.bf16 %v700_v1, %v696_v0  ;;  %v736_v61 = vld [vmem:[#allocation4 + $0x248] sm:$0xff]  ;;  %v742_v0 = vld [vmem:[#allocation4 + $0x278] sm:$0xff] }
  0xa2   :  { %1355 = vmatpush1.bf16.msra.mxu0 %v1354_v7  ;;  %v695_v7 = vld [vmem:[#allocation4 + $0x100] sm:$0xff] }
  0xa3   :  { %1483 = vmatpush1.bf16.msra.mxu1 %v1482_v8  ;;  %1357 = vmatprep.subr.bf16.mxu0 %v1356_v9  ;;  %v699_v8 = vld [vmem:[#allocation4 + $0x120] sm:$0xff]  ;;  %v697_v9 = vld [vmem:[#allocation4 + $0x110] sm:$0xff] }
  0xa4   :  { %1485 = vmatprep.subr.bf16.mxu1 %v1484_v14  ;;  %v708_v14 = vld [vmem:[#allocation4 + $0x168] sm:$0xff]  ;;  %v1506_v17 = vpack.c.bf16 %v699_v8, %v695_v7  ;;  %v1634_v18 = vpack.c.bf16 %v701_v12, %v697_v9  ;;  %v1652_v7 = vpack.c.bf16 %v742_v0, %v738_v63  ;;  %v741_v8 = vld [vmem:[#allocation4 + $0x270] sm:$0xff]  ;;  %v746_v12 = vld [vmem:[#allocation4 + $0x298] sm:$0xff] }
  0xa5   :  { %v1508_v19 = vpack.c.bf16 %v708_v14, %v704_v13  ;;  %v744_v9 = vld [vmem:[#allocation4 + $0x288] sm:$0xff]  ;;  %v750_v13 = vld [vmem:[#allocation4 + $0x2b8] sm:$0xff] }
  0xa6   :  { %1359 = vmatpush1.bf16.msra.mxu0 %v1358_v20  ;;  %v703_v20 = vld [vmem:[#allocation4 + $0x140] sm:$0xff]  ;;  %v782_v0 = vld [vmem:[#allocation4 + $0x3b8] sm:$0xff] }
  0xa7   :  { %1487 = vmatpush1.bf16.msra.mxu1 %v1486_v21  ;;  %1489 = vmatprep.subr.bf16.mxu0 %v1488_v23  ;;  %v707_v21 = vld [vmem:[#allocation4 + $0x160] sm:$0xff]  ;;  %v705_v23 = vld [vmem:[#allocation4 + $0x150] sm:$0xff] }
  0xa8   :  { %1617 = vmatprep.subr.bf16.mxu1 %v1616_v28  ;;  %v716_v28 = vld [vmem:[#allocation4 + $0x1a8] sm:$0xff]  ;;  %v1510_v31 = vpack.c.bf16 %v707_v21, %v703_v20  ;;  %v1638_v32 = vpack.c.bf16 %v709_v26, %v705_v23  ;;  %v1656_v20 = vpack.c.bf16 %v750_v13, %v746_v12  ;;  %v749_v21 = vld [vmem:[#allocation4 + $0x2b0] sm:$0xff]  ;;  %v754_v26 = vld [vmem:[#allocation4 + $0x2d8] sm:$0xff] }
  0xa9   :  { %463 = vmatmul.mubr.f32.vlgmr.msra.gmra.mrb[0].mxu0 %v1881_v22  ;;  %v1512_v33 = vpack.c.bf16 %v716_v28, %v712_v27  ;;  %v752_v23 = vld [vmem:[#allocation4 + $0x2c8] sm:$0xff]  ;;  %v758_v27 = vld [vmem:[#allocation4 + $0x2f8] sm:$0xff] }
  0xaa   :  { %605 = vmatmul.mubr.f32.vlgmr.msra.gmra.mrb[0].mxu1 %v1881_v22  ;;  %1491 = vmatpush1.bf16.msra.mxu0 %v1490_v34  ;;  %v1626_v22 = vpack.c.bf16 %v685_v25, %v681_v51  ;;  %v711_v34 = vld [vmem:[#allocation4 + $0x180] sm:$0xff]  ;;  %v728_v51 = vld [vmem:[#allocation4 + $0x208] sm:$0xff]  ;;  %v730_v25 = vld [vmem:[#allocation4 + $0x218] sm:$0xff] }
  0xab   :  { %1619 = vmatpush1.bf16.msra.mxu1 %v1618_v35  ;;  %1493 = vmatprep.subr.bf16.mxu0 %v1492_v36  ;;  %v715_v35 = vld [vmem:[#allocation4 + $0x1a0] sm:$0xff]  ;;  %v713_v36 = vld [vmem:[#allocation4 + $0x190] sm:$0xff]  ;;  %v1648_v59 = vpack.c.bf16 %v734_v53, %v730_v25  ;;  %v774_v25 = vld [vmem:[#allocation4 + $0x378] sm:$0xff] }
  0xac   :  { %1621 = vmatprep.subr.bf16.mxu1 %v1620_v40  ;;  %v724_v40 = vld [vmem:[#allocation4 + $0x1e8] sm:$0xff]  ;;  %v1514_v43 = vpack.c.bf16 %v715_v35, %v711_v34  ;;  %v1642_v44 = vpack.c.bf16 %v717_v38, %v713_v36  ;;  %v753_v34 = vld [vmem:[#allocation4 + $0x2d0] sm:$0xff]  ;;  %v790_v13 = vld [vmem:[#allocation4 + $0x3f8] sm:$0xff] }
  0xad   :  { %v1516_v45 = vpack.c.bf16 %v724_v40, %v720_v39  ;;  %v757_v35 = vld [vmem:[#allocation4 + $0x2f0] sm:$0xff]  ;;  %v760_v38 = vld [vmem:[#allocation4 + $0x308] sm:$0xff]  ;;  %v762_v40 = vld [vmem:[#allocation4 + $0x318] sm:$0xff] }
  0xae   :  { %1495 = vmatpush1.bf16.msra.mxu0 %v1494_v46  ;;  %v719_v46 = vld [vmem:[#allocation4 + $0x1c0] sm:$0xff]  ;;  %v764_v39 = vld [vmem:[#allocation4 + $0x328] sm:$0xff] }
  0xaf   :  { %1623 = vmatpush1.bf16.msra.mxu1 %v1622_v47  ;;  %1497 = vmatprep.subr.bf16.mxu0 %v1496_v48  ;;  %v723_v47 = vld [vmem:[#allocation4 + $0x1e0] sm:$0xff]  ;;  %v721_v48 = vld [vmem:[#allocation4 + $0x1d0] sm:$0xff]  ;;  %v1536_v41 = vpack.c.bf16 %v764_v39, %v760_v38 }
  0xb0   :  { %1625 = vmatprep.subr.bf16.mxu1 %v1624_v52  ;;  %v732_v52 = vld [vmem:[#allocation4 + $0x228] sm:$0xff]  ;;  %v1518_v54 = vpack.c.bf16 %v723_v47, %v719_v46  ;;  %v1646_v55 = vpack.c.bf16 %v725_v50, %v721_v48  ;;  %v761_v47 = vld [vmem:[#allocation4 + $0x310] sm:$0xff]  ;;  %v611_v39 = vld [vmem:[%s1910_s2] sm:$0xff] }
  0xb1   :  { %v1520_v56 = vpack.c.bf16 %v732_v52, %v728_v51  ;;  %v765_v48 = vld [vmem:[#allocation4 + $0x330] sm:$0xff]  ;;  %v768_v50 = vld [vmem:[#allocation4 + $0x348] sm:$0xff]  ;;  %v770_v52 = vld [vmem:[#allocation4 + $0x358] sm:$0xff] }
  0xb2   :  { %1499 = vmatpush1.bf16.msra.mxu0 %v1498_v57  ;;  %v727_v57 = vld [vmem:[#allocation4 + $0x200] sm:$0xff]  ;;  %v772_v51 = vld [vmem:[#allocation4 + $0x368] sm:$0xff] }
  0xb3   :  { %1627 = vmatpush1.bf16.msra.mxu1 %v1626_v22  ;;  %1501 = vmatprep.subr.bf16.mxu0 %v1500_v58  ;;  %v731_v22 = vld [vmem:[#allocation4 + $0x220] sm:$0xff]  ;;  %v729_v58 = vld [vmem:[#allocation4 + $0x210] sm:$0xff]  ;;  %v1540_v53 = vpack.c.bf16 %v772_v51, %v768_v50  ;;  %v800_v51 = vld [vmem:[#allocation4 + $0x448] sm:$0xff] }
  0xb4   :  { %1629 = vmatprep.subr.bf16.mxu1 %v1628_v62  ;;  %v740_v62 = vld [vmem:[#allocation4 + $0x268] sm:$0xff]  ;;  %v1522_v1 = vpack.c.bf16 %v731_v22, %v727_v57  ;;  %v1650_v2 = vpack.c.bf16 %v733_v60, %v729_v58  ;;  %v769_v57 = vld [vmem:[#allocation4 + $0x350] sm:$0xff] }
  0xb5   :  { %v1524_v3 = vpack.c.bf16 %v740_v62, %v736_v61  ;;  %v773_v58 = vld [vmem:[#allocation4 + $0x370] sm:$0xff]  ;;  %v776_v60 = vld [vmem:[#allocation4 + $0x388] sm:$0xff]  ;;  %v778_v62 = vld [vmem:[#allocation4 + $0x398] sm:$0xff] }
  0xb6   :  { %1503 = vmatpush1.bf16.msra.mxu0 %v1502_v4  ;;  %v735_v4 = vld [vmem:[#allocation4 + $0x240] sm:$0xff]  ;;  %v780_v61 = vld [vmem:[#allocation4 + $0x3a8] sm:$0xff] }
  0xb7   :  { %1631 = vmatpush1.bf16.msra.mxu1 %v1630_v5  ;;  %1505 = vmatprep.subr.bf16.mxu0 %v1504_v6  ;;  %v739_v5 = vld [vmem:[#allocation4 + $0x260] sm:$0xff]  ;;  %v737_v6 = vld [vmem:[#allocation4 + $0x250] sm:$0xff]  ;;  %v1544_v63 = vpack.c.bf16 %v780_v61, %v776_v60 }
  0xb8   :  { %1633 = vmatprep.subr.bf16.mxu1 %v1632_v10  ;;  %v748_v10 = vld [vmem:[#allocation4 + $0x2a8] sm:$0xff]  ;;  %v1526_v14 = vpack.c.bf16 %v739_v5, %v735_v4  ;;  %v1654_v15 = vpack.c.bf16 %v741_v8, %v737_v6  ;;  %v777_v5 = vld [vmem:[#allocation4 + $0x390] sm:$0xff] }
  0xb9   :  { %v1528_v16 = vpack.c.bf16 %v748_v10, %v744_v9  ;;  %v781_v6 = vld [vmem:[#allocation4 + $0x3b0] sm:$0xff]  ;;  %v784_v8 = vld [vmem:[#allocation4 + $0x3c8] sm:$0xff]  ;;  %v786_v10 = vld [vmem:[#allocation4 + $0x3d8] sm:$0xff] }
  0xba   :  { %1507 = vmatpush1.bf16.msra.mxu0 %v1506_v17  ;;  %v743_v17 = vld [vmem:[#allocation4 + $0x280] sm:$0xff]  ;;  %v788_v9 = vld [vmem:[#allocation4 + $0x3e8] sm:$0xff]  ;;  %v801_v60 = vld [vmem:[#allocation4 + $0x450] sm:$0xff] }
  0xbb   :  { %1635 = vmatpush1.bf16.msra.mxu1 %v1634_v18  ;;  %1509 = vmatprep.subr.bf16.mxu0 %v1508_v19  ;;  %v747_v18 = vld [vmem:[#allocation4 + $0x2a0] sm:$0xff]  ;;  %v745_v19 = vld [vmem:[#allocation4 + $0x290] sm:$0xff]  ;;  %v1548_v12 = vpack.c.bf16 %v788_v9, %v784_v8 }
  0xbc   :  { %1637 = vmatprep.subr.bf16.mxu1 %v1636_v24  ;;  %v756_v24 = vld [vmem:[#allocation4 + $0x2e8] sm:$0xff]  ;;  %v1530_v28 = vpack.c.bf16 %v747_v18, %v743_v17  ;;  %v1658_v29 = vpack.c.bf16 %v749_v21, %v745_v19  ;;  %v785_v18 = vld [vmem:[#allocation4 + $0x3d0] sm:$0xff]  ;;  %v811_v8 = vld [vmem:[#allocation4 + $0x4a0] sm:$0xff] }
  0xbd   :  { %v1532_v30 = vpack.c.bf16 %v756_v24, %v752_v23  ;;  %v789_v19 = vld [vmem:[#allocation4 + $0x3f0] sm:$0xff]  ;;  %v792_v21 = vld [vmem:[#allocation4 + $0x408] sm:$0xff]  ;;  %v794_v24 = vld [vmem:[#allocation4 + $0x418] sm:$0xff] }
  0xbe   :  { %1511 = vmatpush1.bf16.msra.mxu0 %v1510_v31  ;;  %v751_v31 = vld [vmem:[#allocation4 + $0x2c0] sm:$0xff]  ;;  %v796_v23 = vld [vmem:[#allocation4 + $0x428] sm:$0xff]  ;;  %v805_v61 = vld [vmem:[#allocation4 + $0x470] sm:$0xff] }
  0xbf   :  { %1639 = vmatpush1.bf16.msra.mxu1 %v1638_v32  ;;  %1513 = vmatprep.subr.bf16.mxu0 %v1512_v33  ;;  %v755_v32 = vld [vmem:[#allocation4 + $0x2e0] sm:$0xff]  ;;  %v1660_v33 = vpack.c.bf16 %v758_v27, %v754_v26  ;;  %v1552_v26 = vpack.c.bf16 %v796_v23, %v792_v21  ;;  %v798_v27 = vld [vmem:[#allocation4 + $0x438] sm:$0xff] }
  0xc0   :  { %1641 = vmatprep.subr.bf16.mxu1 %v1640_v37  ;;  %v1534_v36 = vpack.c.bf16 %v755_v32, %v751_v31  ;;  %v1662_v37 = vpack.c.bf16 %v757_v35, %v753_v34  ;;  %v819_v21 = vld [vmem:[#allocation4 + $0x4e0] sm:$0xff] }
  0xc2   :  { %1515 = vmatpush1.bf16.msra.mxu0 %v1514_v43  ;;  %v759_v43 = vld [vmem:[#allocation4 + $0x300] sm:$0xff] }
  0xc3   :  { %1643 = vmatpush1.bf16.msra.mxu1 %v1642_v44  ;;  %1517 = vmatprep.subr.bf16.mxu0 %v1516_v45  ;;  %v763_v44 = vld [vmem:[#allocation4 + $0x320] sm:$0xff]  ;;  %v1664_v45 = vpack.c.bf16 %v766_v42, %v762_v40 }
  0xc4   :  { %1645 = vmatprep.subr.bf16.mxu1 %v1644_v49  ;;  %v1538_v46 = vpack.c.bf16 %v763_v44, %v759_v43  ;;  %v1666_v49 = vpack.c.bf16 %v765_v48, %v761_v47  ;;  %v791_v44 = vld [vmem:[#allocation4 + $0x400] sm:$0xff]  ;;  %v797_v47 = vld [vmem:[#allocation4 + $0x430] sm:$0xff] }
  0xc6   :  { %1519 = vmatpush1.bf16.msra.mxu0 %v1518_v54  ;;  %v1668_v54 = vpack.c.bf16 %v774_v25, %v770_v52  ;;  %v804_v25 = vld [vmem:[#allocation4 + $0x468] sm:$0xff] }
  0xc7   :  { %1647 = vmatpush1.bf16.msra.mxu1 %v1646_v55  ;;  %1521 = vmatprep.subr.bf16.mxu0 %v1520_v56  ;;  %v767_v55 = vld [vmem:[#allocation4 + $0x340] sm:$0xff] }
  0xc8   :  { %1649 = vmatprep.subr.bf16.mxu1 %v1648_v59  ;;  %v771_v56 = vld [vmem:[#allocation4 + $0x360] sm:$0xff]  ;;  %v1670_v59 = vpack.c.bf16 %v773_v58, %v769_v57 }
  0xc9   :  { %v1542_v22 = vpack.c.bf16 %v771_v56, %v767_v55  ;;  %v803_v58 = vld [vmem:[#allocation4 + $0x460] sm:$0xff] }
  0xca   :  { %1523 = vmatpush1.bf16.msra.mxu0 %v1522_v1  ;;  %v775_v1 = vld [vmem:[#allocation4 + $0x380] sm:$0xff] }
  0xcb   :  { %1651 = vmatpush1.bf16.msra.mxu1 %v1650_v2  ;;  %1525 = vmatprep.subr.bf16.mxu0 %v1524_v3  ;;  %v779_v2 = vld [vmem:[#allocation4 + $0x3a0] sm:$0xff]  ;;  %v1672_v3 = vpack.c.bf16 %v782_v0, %v778_v62  ;;  %v808_v62 = vld [vmem:[#allocation4 + $0x488] sm:$0xff]  ;;  %v1556_v0 = vpack.c.bf16 %v804_v25, %v800_v51  ;;  %v837_v51 = vld [vmem:[#allocation4 + $0x570] sm:$0xff] }
  0xcc   :  { %1653 = vmatprep.subr.bf16.mxu1 %v1652_v7  ;;  %v1546_v4 = vpack.c.bf16 %v779_v2, %v775_v1  ;;  %v1674_v7 = vpack.c.bf16 %v781_v6, %v777_v5  ;;  %v812_v2 = vld [vmem:[#allocation4 + $0x4a8] sm:$0xff]  ;;  %v1686_v6 = vpack.c.bf16 %v805_v61, %v801_v60  ;;  %v841_v61 = vld [vmem:[#allocation4 + $0x590] sm:$0xff] }
  0xcd   :  { %v1560_v9 = vpack.c.bf16 %v812_v2, %v808_v62  ;;  %v844_v25 = vld [vmem:[#allocation4 + $0x5a8] sm:$0xff]  ;;  %v845_v62 = vld [vmem:[#allocation4 + $0x5b0] sm:$0xff]  ;;  %v854_v2 = vld [vmem:[#allocation4 + $0x5f8] sm:$0xff] }
  0xce   :  { %1527 = vmatpush1.bf16.msra.mxu0 %v1526_v14  ;;  %v783_v14 = vld [vmem:[#allocation4 + $0x3c0] sm:$0xff] }
  0xcf   :  { %1655 = vmatpush1.bf16.msra.mxu1 %v1654_v15  ;;  %1529 = vmatprep.subr.bf16.mxu0 %v1528_v16  ;;  %v787_v15 = vld [vmem:[#allocation4 + $0x3e0] sm:$0xff]  ;;  %v1676_v16 = vpack.c.bf16 %v790_v13, %v786_v10  ;;  %v813_v13 = vld [vmem:[#allocation4 + $0x4b0] sm:$0xff] }
  0xd0   :  { %1657 = vmatprep.subr.bf16.mxu1 %v1656_v20  ;;  %v1550_v17 = vpack.c.bf16 %v787_v15, %v783_v14  ;;  %v1678_v20 = vpack.c.bf16 %v789_v19, %v785_v18  ;;  %v816_v14 = vld [vmem:[#allocation4 + $0x4c8] sm:$0xff] }
  0xd1   :  { %v820_v15 = vld [vmem:[#allocation4 + $0x4e8] sm:$0xff] }
  0xd2   :  { %1531 = vmatpush1.bf16.msra.mxu0 %v1530_v28  ;;  %v1680_v28 = vpack.c.bf16 %v798_v27, %v794_v24  ;;  %v1564_v23 = vpack.c.bf16 %v820_v15, %v816_v14  ;;  %v821_v27 = vld [vmem:[#allocation4 + $0x4f0] sm:$0xff]  ;;  %v858_v14 = vld [vmem:[#allocation4 + $0x618] sm:$0xff] }
  0xd3   :  { %1659 = vmatpush1.bf16.msra.mxu1 %v1658_v29  ;;  %1533 = vmatprep.subr.bf16.mxu0 %v1532_v30  ;;  %v862_v15 = vld [vmem:[#allocation4 + $0x638] sm:$0xff] }
  0xd4   :  { %1661 = vmatprep.subr.bf16.mxu1 %v1660_v33 }
  0xd6   :  { %1535 = vmatpush1.bf16.msra.mxu0 %v1534_v36 }
  0xd7   :  { %1663 = vmatpush1.bf16.msra.mxu1 %v1662_v37  ;;  %1537 = vmatprep.subr.bf16.mxu0 %v1536_v41  ;;  %v612_v37 = vld [vmem:[%s1909_s1] sm:$0xff] }
  0xd8   :  { %1665 = vmatprep.subr.bf16.mxu1 %v1664_v45  ;;  %v795_v45 = vld [vmem:[#allocation4 + $0x420] sm:$0xff] }
  0xd9   :  { %v1554_v52 = vpack.c.bf16 %v795_v45, %v791_v44 }
  0xda   :  { %1539 = vmatpush1.bf16.msra.mxu0 %v1538_v46  ;;  %v793_v46 = vld [vmem:[#allocation4 + $0x410] sm:$0xff] }
  0xdb   :  { %1667 = vmatpush1.bf16.msra.mxu1 %v1666_v49  ;;  %1541 = vmatprep.subr.bf16.mxu0 %v1540_v53  ;;  %v802_v53 = vld [vmem:[#allocation4 + $0x458] sm:$0xff]  ;;  %v1682_v57 = vpack.c.bf16 %v797_v47, %v793_v46  ;;  %v831_v46 = vld [vmem:[#allocation4 + $0x540] sm:$0xff] }
  0xdc   :  { %1669 = vmatprep.subr.bf16.mxu1 %v1668_v54  ;;  %v806_v54 = vld [vmem:[#allocation4 + $0x478] sm:$0xff]  ;;  %v835_v47 = vld [vmem:[#allocation4 + $0x560] sm:$0xff] }
  0xdd   :  { %v1684_v1 = vpack.c.bf16 %v806_v54, %v802_v53  ;;  %v842_v53 = vld [vmem:[#allocation4 + $0x598] sm:$0xff] }
  0xde   :  { %1543 = vmatpush1.bf16.msra.mxu0 %v1542_v22  ;;  %v799_v22 = vld [vmem:[#allocation4 + $0x440] sm:$0xff]  ;;  %v846_v54 = vld [vmem:[#allocation4 + $0x5b8] sm:$0xff] }
  0xdf   :  { %1671 = vmatpush1.bf16.msra.mxu1 %v1670_v59  ;;  %1545 = vmatprep.subr.bf16.mxu0 %v1544_v63  ;;  %v1558_v5 = vpack.c.bf16 %v803_v58, %v799_v22  ;;  %v843_v22 = vld [vmem:[#allocation4 + $0x5a0] sm:$0xff]  ;;  %v1704_v60 = vpack.c.bf16 %v846_v54, %v842_v53 }
  0xe0   :  { %1673 = vmatprep.subr.bf16.mxu1 %v1672_v3  ;;  %v810_v3 = vld [vmem:[#allocation4 + $0x498] sm:$0xff] }
  0xe2   :  { %1547 = vmatpush1.bf16.msra.mxu0 %v1546_v4  ;;  %v814_v4 = vld [vmem:[#allocation4 + $0x4b8] sm:$0xff] }
  0xe3   :  { %1675 = vmatpush1.bf16.msra.mxu1 %v1674_v7  ;;  %1549 = vmatprep.subr.bf16.mxu0 %v1548_v12  ;;  %v807_v7 = vld [vmem:[#allocation4 + $0x480] sm:$0xff]  ;;  %v1688_v10 = vpack.c.bf16 %v814_v4, %v810_v3  ;;  %v809_v12 = vld [vmem:[#allocation4 + $0x490] sm:$0xff]  ;;  %v1706_v4 = vpack.c.bf16 %v845_v62, %v841_v61  ;;  %v888_v61 = vld [vmem:[#allocation4 + $0x708] sm:$0xff] }
  0xe4   :  { %1677 = vmatprep.subr.bf16.mxu1 %v1676_v16  ;;  %v818_v16 = vld [vmem:[#allocation4 + $0x4d8] sm:$0xff]  ;;  %v1562_v18 = vpack.c.bf16 %v811_v8, %v807_v7  ;;  %v1690_v19 = vpack.c.bf16 %v813_v13, %v809_v12  ;;  %v856_v12 = vld [vmem:[#allocation4 + $0x608] sm:$0xff] }
  0xe5   :  { %v860_v13 = vld [vmem:[#allocation4 + $0x628] sm:$0xff] }
  0xe6   :  { %1551 = vmatpush1.bf16.msra.mxu0 %v1550_v17  ;;  %v822_v17 = vld [vmem:[#allocation4 + $0x4f8] sm:$0xff]  ;;  %v892_v62 = vld [vmem:[#allocation4 + $0x728] sm:$0xff] }
  0xe7   :  { %1679 = vmatpush1.bf16.msra.mxu1 %v1678_v20  ;;  %1553 = vmatprep.subr.bf16.mxu0 %v1552_v26  ;;  %v815_v20 = vld [vmem:[#allocation4 + $0x4c0] sm:$0xff]  ;;  %v1692_v24 = vpack.c.bf16 %v822_v17, %v818_v16  ;;  %v817_v26 = vld [vmem:[#allocation4 + $0x4d0] sm:$0xff] }
  0xe8   :  { %1681 = vmatprep.subr.bf16.mxu1 %v1680_v28  ;;  %v824_v28 = vld [vmem:[#allocation4 + $0x508] sm:$0xff] }
 0x17c   :  { %v464_v29 = vpop.f32.mrb[0].mxu0 }
 0x17d   :  { %v606_v30 = vpop.f32.mrb[0].mxu1  ;;  %v466_v31 = vpop.f32.mrb[1].mxu0 }
 0x17e   :  { %v617_v32 = vcombine.low %v464_v29, %v466_v31  ;;  %v608_v33 = vpop.f32.mrb[1].mxu1 }
 0x17f   :  { %v618_v34 = vcombine.low %v606_v30, %v608_v33 }
 0x180   :  { %v625_v35 = vrot.slane %v617_v32, %v1865_v11  ;;  %v1566_v32 = vpack.c.bf16 %v819_v21, %v815_v20  ;;  %v1584_v20 = vpack.c.bf16 %v860_v13, %v856_v12  ;;  %v1712_v21 = vpack.c.bf16 %v862_v15, %v858_v14  ;;  %v898_v12 = vld [vmem:[#allocation4 + $0x758] sm:$0xff] }
 0x181   :  { %v632_v36 = vrot.slane %v618_v34, %v1865_v11  ;;  %v823_v34 = vld [vmem:[#allocation4 + $0x500] sm:$0xff]  ;;  %v902_v13 = vld [vmem:[#allocation4 + $0x778] sm:$0xff] }
 0x183   :  { %v633_v38 = vcombine.low %v625_v35, %v632_v36  ;;  %v827_v35 = vld [vmem:[#allocation4 + $0x520] sm:$0xff] }
 0x184   :  { %v1570_v44 = vpack.c.bf16 %v827_v35, %v823_v34 }
 0x185   :  { %v635_v40 = vsub.f32 %v612_v37, %v633_v38  ;;  %v825_v38 = vld [vmem:[#allocation4 + $0x510] sm:$0xff] }
 0x187   :  { %v636_v41 = vmul.f32 %v635_v40, %v611_v39  ;;  %v829_v39 = vld [vmem:[#allocation4 + $0x530] sm:$0xff]  ;;  %v832_v40 = vld [vmem:[#allocation4 + $0x548] sm:$0xff] }
 0x188   :  { %v1698_v45 = vpack.c.bf16 %v829_v39, %v825_v38  ;;  %v872_v38 = vld [vmem:[#allocation4 + $0x688] sm:$0xff] }
 0x189   :  { %v638_v42 = vcombine.high %v636_v41, %v636_v41  ;;  %v645_v43 = vrot.slane %v636_v41, %v1865_v11  ;;  %v836_v41 = vld [vmem:[#allocation4 + $0x568] sm:$0xff] }
 0x18a   :  { %v876_v39 = vld [vmem:[#allocation4 + $0x6a8] sm:$0xff] }
 0x18b   :  { %v652_v48 = vrot.slane %v638_v42, %v1865_v11  ;;  %v653_v49 = vcombine.high %v645_v43, %v645_v43  ;;  %v659_v50 = vadd.f32 %v645_v43, %v464_v29  ;;  %v828_v29 = vld [vmem:[#allocation4 + $0x528] sm:$0xff]  ;;  %v834_v42 = vld [vmem:[#allocation4 + $0x558] sm:$0xff] }
 0x18c   :  { %v1568_v36 = vpack.c.bf16 %v828_v29, %v824_v28  ;;  %v838_v43 = vld [vmem:[#allocation4 + $0x578] sm:$0xff] }
 0x18d   :  { %v654_v55 = vcombine.high %v652_v48, %v652_v48  ;;  %v660_v56 = vadd.f32 %v653_v49, %v466_v31  ;;  %v1899_v59 = vadd.f32 %v652_v48, %v606_v30  ;;  %v826_v30 = vld [vmem:[#allocation4 + $0x518] sm:$0xff]  ;;  %v1572_v48 = vpack.c.bf16 %v836_v41, %v832_v40 }
 0x18e   :  { %v830_v31 = vld [vmem:[#allocation4 + $0x538] sm:$0xff]  ;;  %v1700_v49 = vpack.c.bf16 %v838_v43, %v834_v42 }
 0x18f   :  { %v662_v63 = vadd.f32 %v654_v55, %v608_v33  ;;  %983 = vmatprep.mubr.f32.mxu0 %v660_v56  ;;  %1125 = vmatprep.mubr.f32.mxu1 %v660_v56  ;;  %v1694_v33 = vpack.c.bf16 %v821_v27, %v817_v26  ;;  %v1696_v37 = vpack.c.bf16 %v830_v31, %v826_v30  ;;  %v864_v26 = vld [vmem:[#allocation4 + $0x648] sm:$0xff]  ;;  %v866_v28 = vld [vmem:[#allocation4 + $0x658] sm:$0xff] }
 0x190   :  { %984 = vmatmul.mubr.f32.vlgmr.msra.gmra.mrb[2].mxu0 %v659_v50  ;;  %1126 = vmatmul.mubr.f32.vlgmr.msra.gmra.mrb[2].mxu1 %v659_v50  ;;  %v833_v50 = vld [vmem:[#allocation4 + $0x550] sm:$0xff]  ;;  %v1574_v55 = vpack.c.bf16 %v835_v47, %v831_v46  ;;  %v868_v27 = vld [vmem:[#allocation4 + $0x668] sm:$0xff]  ;;  %v870_v29 = vld [vmem:[#allocation4 + $0x678] sm:$0xff]  ;;  %v1592_v46 = vpack.c.bf16 %v876_v39, %v872_v38 }
 0x191   :  { %1555 = vmatpush1.bf16.msra.mxu0 %v1554_v52  ;;  %1683 = vmatpush1.bf16.msra.mxu1 %v1682_v57  ;;  %v840_v52 = vld [vmem:[#allocation4 + $0x588] sm:$0xff]  ;;  %v1702_v56 = vpack.c.bf16 %v837_v51, %v833_v50  ;;  %v839_v57 = vld [vmem:[#allocation4 + $0x580] sm:$0xff]  ;;  %v1588_v34 = vpack.c.bf16 %v868_v27, %v864_v26  ;;  %v1716_v35 = vpack.c.bf16 %v870_v29, %v866_v28  ;;  %v874_v40 = vld [vmem:[#allocation4 + $0x698] sm:$0xff] }
 0x192   :  { %1054 = vmatprep.mubr.f32.mxu0 %v662_v63  ;;  %1196 = vmatprep.mubr.f32.mxu1 %v662_v63  ;;  %v1576_v58 = vpack.c.bf16 %v844_v25, %v840_v52  ;;  %v848_v63 = vld [vmem:[#allocation4 + $0x5c8] sm:$0xff]  ;;  %v1578_v3 = vpack.c.bf16 %v843_v22, %v839_v57  ;;  %v878_v41 = vld [vmem:[#allocation4 + $0x6b8] sm:$0xff] }
 0x193   :  { %1557 = vmatprep.subr.bf16.mxu0 %v1556_v0  ;;  %1685 = vmatprep.subr.bf16.mxu1 %v1684_v1  ;;  %v852_v0 = vld [vmem:[#allocation4 + $0x5e8] sm:$0xff]  ;;  %v850_v1 = vld [vmem:[#allocation4 + $0x5d8] sm:$0xff]  ;;  %v1720_v47 = vpack.c.bf16 %v878_v41, %v874_v40 }
 0x194   :  { %v1580_v7 = vpack.c.bf16 %v852_v0, %v848_v63  ;;  %v1708_v8 = vpack.c.bf16 %v854_v2, %v850_v1  ;;  %v880_v50 = vld [vmem:[#allocation4 + $0x6c8] sm:$0xff]  ;;  %v882_v52 = vld [vmem:[#allocation4 + $0x6d8] sm:$0xff] }
 0x195   :  { %1559 = vmatpush1.bf16.msra.mxu0 %v1558_v5  ;;  %1687 = vmatpush1.bf16.msra.mxu1 %v1686_v6  ;;  %v847_v5 = vld [vmem:[#allocation4 + $0x5c0] sm:$0xff]  ;;  %v884_v51 = vld [vmem:[#allocation4 + $0x6e8] sm:$0xff]  ;;  %v886_v25 = vld [vmem:[#allocation4 + $0x6f8] sm:$0xff] }
 0x196   :  { %1561 = vmatprep.subr.bf16.mxu0 %v1560_v9  ;;  %1689 = vmatprep.subr.bf16.mxu1 %v1688_v10  ;;  %v851_v6 = vld [vmem:[#allocation4 + $0x5e0] sm:$0xff]  ;;  %v849_v9 = vld [vmem:[#allocation4 + $0x5d0] sm:$0xff]  ;;  %v1596_v57 = vpack.c.bf16 %v884_v51, %v880_v50  ;;  %v1724_v22 = vpack.c.bf16 %v886_v25, %v882_v52  ;;  %v890_v63 = vld [vmem:[#allocation4 + $0x718] sm:$0xff] }
 0x197   :  { %v853_v10 = vld [vmem:[#allocation4 + $0x5f0] sm:$0xff]  ;;  %v1582_v16 = vpack.c.bf16 %v851_v6, %v847_v5  ;;  %v894_v0 = vld [vmem:[#allocation4 + $0x738] sm:$0xff]  ;;  %v1600_v5 = vpack.c.bf16 %v892_v62, %v888_v61 }
 0x198   :  { %v1710_v17 = vpack.c.bf16 %v853_v10, %v849_v9  ;;  %v1728_v6 = vpack.c.bf16 %v894_v0, %v890_v63  ;;  %v896_v9 = vld [vmem:[#allocation4 + $0x748] sm:$0xff]  ;;  %v906_v26 = vld [vmem:[#allocation4 + $0x798] sm:$0xff] }
 0x199   :  { %1563 = vmatpush1.bf16.msra.mxu0 %v1562_v18  ;;  %1691 = vmatpush1.bf16.msra.mxu1 %v1690_v19  ;;  %v855_v18 = vld [vmem:[#allocation4 + $0x600] sm:$0xff]  ;;  %v900_v10 = vld [vmem:[#allocation4 + $0x768] sm:$0xff]  ;;  %v910_v27 = vld [vmem:[#allocation4 + $0x7b8] sm:$0xff] }
 0x19a   :  { %1565 = vmatprep.subr.bf16.mxu0 %v1564_v23  ;;  %1693 = vmatprep.subr.bf16.mxu1 %v1692_v24  ;;  %v859_v19 = vld [vmem:[#allocation4 + $0x620] sm:$0xff]  ;;  %v857_v23 = vld [vmem:[#allocation4 + $0x610] sm:$0xff]  ;;  %v914_v38 = vld [vmem:[#allocation4 + $0x7d8] sm:$0xff] }
 0x19b   :  { %v861_v24 = vld [vmem:[#allocation4 + $0x630] sm:$0xff]  ;;  %v1586_v30 = vpack.c.bf16 %v859_v19, %v855_v18  ;;  %v1604_v18 = vpack.c.bf16 %v900_v10, %v896_v9  ;;  %v1732_v19 = vpack.c.bf16 %v902_v13, %v898_v12  ;;  %v918_v39 = vld [vmem:[#allocation4 + $0x7f8] sm:$0xff] }
 0x19c   :  { %v1714_v31 = vpack.c.bf16 %v861_v24, %v857_v23  ;;  %v904_v23 = vld [vmem:[#allocation4 + $0x788] sm:$0xff] }
 0x19d   :  { %1567 = vmatpush1.bf16.msra.mxu0 %v1566_v32  ;;  %1695 = vmatpush1.bf16.msra.mxu1 %v1694_v33  ;;  %v863_v32 = vld [vmem:[#allocation4 + $0x640] sm:$0xff]  ;;  %v908_v24 = vld [vmem:[#allocation4 + $0x7a8] sm:$0xff] }
 0x19e   :  { %1569 = vmatprep.subr.bf16.mxu0 %v1568_v36  ;;  %1697 = vmatprep.subr.bf16.mxu1 %v1696_v37  ;;  %v867_v33 = vld [vmem:[#allocation4 + $0x660] sm:$0xff]  ;;  %v865_v36 = vld [vmem:[#allocation4 + $0x650] sm:$0xff] }
 0x19f   :  { %v869_v37 = vld [vmem:[#allocation4 + $0x670] sm:$0xff]  ;;  %v1590_v42 = vpack.c.bf16 %v867_v33, %v863_v32  ;;  %v1608_v32 = vpack.c.bf16 %v908_v24, %v904_v23  ;;  %v1736_v33 = vpack.c.bf16 %v910_v27, %v906_v26 }
 0x1a0   :  { %v1718_v43 = vpack.c.bf16 %v869_v37, %v865_v36  ;;  %v912_v36 = vld [vmem:[#allocation4 + $0x7c8] sm:$0xff] }
 0x1a1   :  { %1571 = vmatpush1.bf16.msra.mxu0 %v1570_v44  ;;  %1699 = vmatpush1.bf16.msra.mxu1 %v1698_v45  ;;  %v871_v44 = vld [vmem:[#allocation4 + $0x680] sm:$0xff]  ;;  %v916_v37 = vld [vmem:[#allocation4 + $0x7e8] sm:$0xff] }
 0x1a2   :  { %1573 = vmatprep.subr.bf16.mxu0 %v1572_v48  ;;  %1701 = vmatprep.subr.bf16.mxu1 %v1700_v49  ;;  %v875_v45 = vld [vmem:[#allocation4 + $0x6a0] sm:$0xff]  ;;  %v873_v48 = vld [vmem:[#allocation4 + $0x690] sm:$0xff] }
 0x1a3   :  { %v877_v49 = vld [vmem:[#allocation4 + $0x6b0] sm:$0xff]  ;;  %v1594_v53 = vpack.c.bf16 %v875_v45, %v871_v44  ;;  %v1740_v44 = vpack.c.bf16 %v918_v39, %v914_v38  ;;  %v915_v45 = vld [vmem:[#allocation4 + $0x7e0] sm:$0xff] }
 0x1a4   :  { %v1722_v54 = vpack.c.bf16 %v877_v49, %v873_v48 }
 0x1a5   :  { %1575 = vmatpush1.bf16.msra.mxu0 %v1574_v55  ;;  %1703 = vmatpush1.bf16.msra.mxu1 %v1702_v56  ;;  %v879_v55 = vld [vmem:[#allocation4 + $0x6c0] sm:$0xff] }
 0x1a6   :  { %1577 = vmatprep.subr.bf16.mxu0 %v1576_v58  ;;  %1705 = vmatprep.subr.bf16.mxu1 %v1704_v60  ;;  %v883_v56 = vld [vmem:[#allocation4 + $0x6e0] sm:$0xff]  ;;  %v881_v58 = vld [vmem:[#allocation4 + $0x6d0] sm:$0xff] }
 0x1a7   :  { %v885_v60 = vld [vmem:[#allocation4 + $0x6f0] sm:$0xff]  ;;  %v1598_v1 = vpack.c.bf16 %v883_v56, %v879_v55 }
 0x1a8   :  { %v1726_v2 = vpack.c.bf16 %v885_v60, %v881_v58 }
 0x1a9   :  { %1579 = vmatpush1.bf16.msra.mxu0 %v1578_v3  ;;  %1707 = vmatpush1.bf16.msra.mxu1 %v1706_v4  ;;  %v887_v3 = vld [vmem:[#allocation4 + $0x700] sm:$0xff] }
 0x1aa   :  { %1581 = vmatprep.subr.bf16.mxu0 %v1580_v7  ;;  %1709 = vmatprep.subr.bf16.mxu1 %v1708_v8  ;;  %v891_v4 = vld [vmem:[#allocation4 + $0x720] sm:$0xff]  ;;  %v889_v7 = vld [vmem:[#allocation4 + $0x710] sm:$0xff] }
 0x1ab   :  { %v893_v8 = vld [vmem:[#allocation4 + $0x730] sm:$0xff]  ;;  %v1602_v14 = vpack.c.bf16 %v891_v4, %v887_v3 }
 0x1ac   :  { %v1730_v15 = vpack.c.bf16 %v893_v8, %v889_v7 }
 0x1ad   :  { %1583 = vmatpush1.bf16.msra.mxu0 %v1582_v16  ;;  %1711 = vmatpush1.bf16.msra.mxu1 %v1710_v17  ;;  %v895_v16 = vld [vmem:[#allocation4 + $0x740] sm:$0xff] }
 0x1ae   :  { %1585 = vmatprep.subr.bf16.mxu0 %v1584_v20  ;;  %1713 = vmatprep.subr.bf16.mxu1 %v1712_v21  ;;  %v899_v17 = vld [vmem:[#allocation4 + $0x760] sm:$0xff]  ;;  %v897_v20 = vld [vmem:[#allocation4 + $0x750] sm:$0xff] }
 0x1af   :  { %v901_v21 = vld [vmem:[#allocation4 + $0x770] sm:$0xff]  ;;  %v1606_v28 = vpack.c.bf16 %v899_v17, %v895_v16 }
 0x1b0   :  { %v1734_v29 = vpack.c.bf16 %v901_v21, %v897_v20 }
 0x1b1   :  { %1587 = vmatpush1.bf16.msra.mxu0 %v1586_v30  ;;  %1715 = vmatpush1.bf16.msra.mxu1 %v1714_v31  ;;  %v903_v30 = vld [vmem:[#allocation4 + $0x780] sm:$0xff] }
 0x1b2   :  { %1589 = vmatprep.subr.bf16.mxu0 %v1588_v34  ;;  %1717 = vmatprep.subr.bf16.mxu1 %v1716_v35  ;;  %v907_v31 = vld [vmem:[#allocation4 + $0x7a0] sm:$0xff]  ;;  %v905_v34 = vld [vmem:[#allocation4 + $0x790] sm:$0xff] }
 0x1b3   :  { %v909_v35 = vld [vmem:[#allocation4 + $0x7b0] sm:$0xff]  ;;  %v1610_v40 = vpack.c.bf16 %v907_v31, %v903_v30 }
 0x1b4   :  { %v1738_v41 = vpack.c.bf16 %v909_v35, %v905_v34 }
 0x1b5   :  { %1591 = vmatpush1.bf16.msra.mxu0 %v1590_v42  ;;  %1719 = vmatpush1.bf16.msra.mxu1 %v1718_v43  ;;  %v911_v42 = vld [vmem:[#allocation4 + $0x7c0] sm:$0xff]  ;;  %v1612_v43 = vpack.c.bf16 %v916_v37, %v912_v36 }
 0x1b6   :  { %1593 = vmatprep.subr.bf16.mxu0 %v1592_v46  ;;  %1721 = vmatprep.subr.bf16.mxu1 %v1720_v47  ;;  %v913_v46 = vld [vmem:[#allocation4 + $0x7d0] sm:$0xff]  ;;  %v1614_v48 = vpack.c.bf16 %v915_v45, %v911_v42 }
 0x1b7   :  { %v917_v47 = vld [vmem:[#allocation4 + $0x7f0] sm:$0xff] }
 0x1b8   :  { %v1742_v49 = vpack.c.bf16 %v917_v47, %v913_v46 }
 0x1b9   :  { %1595 = vmatpush1.bf16.msra.mxu0 %v1594_v53  ;;  %1723 = vmatpush1.bf16.msra.mxu1 %v1722_v54 }
 0x1ba   :  { %1597 = vmatprep.subr.bf16.mxu0 %v1596_v57  ;;  %1725 = vmatprep.subr.bf16.mxu1 %v1724_v22 }
 0x1bd   :  { %1599 = vmatpush1.bf16.msra.mxu0 %v1598_v1  ;;  %1727 = vmatpush1.bf16.msra.mxu1 %v1726_v2 }
 0x1be   :  { %1601 = vmatprep.subr.bf16.mxu0 %v1600_v5  ;;  %1729 = vmatprep.subr.bf16.mxu1 %v1728_v6 }
 0x1c1   :  { %1603 = vmatpush1.bf16.msra.mxu0 %v1602_v14  ;;  %1731 = vmatpush1.bf16.msra.mxu1 %v1730_v15 }
 0x1c2   :  { %1605 = vmatprep.subr.bf16.mxu0 %v1604_v18  ;;  %1733 = vmatprep.subr.bf16.mxu1 %v1732_v19 }
 0x1c5   :  { %1607 = vmatpush1.bf16.msra.mxu0 %v1606_v28  ;;  %1735 = vmatpush1.bf16.msra.mxu1 %v1734_v29 }
 0x1c6   :  { %1609 = vmatprep.subr.bf16.mxu0 %v1608_v32  ;;  %1737 = vmatprep.subr.bf16.mxu1 %v1736_v33 }
 0x1c9   :  { %1611 = vmatpush1.bf16.msra.mxu0 %v1610_v40  ;;  %1739 = vmatpush1.bf16.msra.mxu1 %v1738_v41 }
 0x1ca   :  { %1613 = vmatprep.subr.bf16.mxu0 %v1612_v43  ;;  %1741 = vmatprep.subr.bf16.mxu1 %v1740_v44 }
 0x1cd   :  { %1615 = vmatpush1.bf16.msra.mxu0 %v1614_v48  ;;  %1743 = vmatpush1.bf16.msra.mxu1 %v1742_v49 }
 0x1d0   :  { %1055 = vmatmul.mubr.f32.vlgmr.msra.gmra.mrb[2].mxu0 %v1899_v59  ;;  %1197 = vmatmul.mubr.f32.vlgmr.msra.gmra.mrb[2].mxu1 %v1899_v59 }
 0x2a3   :  { %v1056_v50 = vpop.f32.mrb[2].mxu0  ;;  %v1198_v51 = vpop.f32.mrb[2].mxu1 }
 0x2a4   :  { %v1058_v52 = vpop.f32.mrb[3].mxu0  ;;  %v1200_v25 = vpop.f32.mrb[3].mxu1 }
 0x2a5   :  { %v1207_v53 = vcombine.low %v1056_v50, %v1058_v52  ;;  %v1208_v54 = vcombine.low %v1198_v51, %v1200_v25 }
 0x2a7   :  { %v1215_v55 = vrot.slane %v1207_v53, %v1865_v11  ;;  %v1222_v56 = vrot.slane %v1208_v54, %v1865_v11 }
 0x2a9   :  { %v1223_v57 = vcombine.low %v1215_v55, %v1222_v56 }
 0x2ab   :  { %1225 = vst [vmem:[%s1913_s5] sm:$0xff] %v1223_v57 }
 0x2ac   :  { %1230 = vsyncpa [#allocation3], 1 }
 0x2ad   :  { %1231 = vsyncpa [#allocation5], 1 }

</bundles_post_ra>
